<compile_context>
chip_gen: v7x
topology: tpu7x:2x2x1
jax: 0.10.0
libtpu: 0.0.40
codegen_flags: <defaults>
</compile_context>

<pallas_src>
import jax
import jax.numpy as jnp
from jax.experimental import pallas as pl
from jax.experimental.pallas import tpu as pltpu


# --------------------------------- kernel bodies ---------------------------------

def _ffn_kernel_resident(x_ref, w1_ref, b1_ref, w2_ref, b2_ref, o_ref):
    # Whole W1/W2 resident in VMEM; 1-D grid over M tiles.  No reduction axis, no acc.
    h = jnp.dot(x_ref[...], w1_ref[...], preferred_element_type=jnp.float32)
    h = jnp.maximum(h + b1_ref[...], 0.0)
    # dropout (eval mode) == identity
    acc = jnp.dot(h.astype(w2_ref.dtype), w2_ref[...],
                  preferred_element_type=jnp.float32)
    o_ref[...] = (acc + b2_ref[...]).astype(o_ref.dtype)


def _ffn_kernel_sliced_f32out(x_ref, w1_ref, b1_ref, w2_ref, b2_ref, o_ref):
    # ff-sliced reduction; output dtype is f32, so accumulate directly into the resident
    # o_ref block (its block index is constant across the ff axis) -> no scratch needed.
    ff = pl.program_id(1)
    h = jnp.dot(x_ref[...], w1_ref[...], preferred_element_type=jnp.float32)
    h = jnp.maximum(h + b1_ref[...], 0.0)
    contrib = jnp.dot(h.astype(w2_ref.dtype), w2_ref[...],
                      preferred_element_type=jnp.float32)

    @pl.when(ff == 0)
    def _():
        o_ref[...] = contrib + b2_ref[...]

    @pl.when(ff != 0)
    def _():
        o_ref[...] += contrib


def _ffn_kernel_sliced_acc(x_ref, w1_ref, b1_ref, w2_ref, b2_ref, o_ref, acc_ref):
    # ff-sliced reduction with f32 VMEM accumulator (needed when output dtype != f32).
    ff = pl.program_id(1)

    @pl.when(ff == 0)
    def _():
        acc_ref[...] = jnp.zeros_like(acc_ref)

    h = jnp.dot(x_ref[...], w1_ref[...], preferred_element_type=jnp.float32)
    h = jnp.maximum(h + b1_ref[...], 0.0)
    acc_ref[...] += jnp.dot(h.astype(w2_ref.dtype), w2_ref[...],
                            preferred_element_type=jnp.float32)

    @pl.when(ff == pl.num_programs(1) - 1)
    def _():
        o_ref[...] = (acc_ref[...] + b2_ref[...]).astype(o_ref.dtype)


# --------------------------------- sizing helpers ---------------------------------

def _vmem_capacity_bytes():
    try:
        return int(pltpu.get_tpu_info().vmem_capacity_bytes)
    except Exception:
        return 64 << 20  # conservative fallback: v7x per-TensorCore VMEM


def _divisor_tile(dim, preferred, granules=(256, 128, 8)):
    """Largest t <= preferred with dim % t == 0 and t a multiple of a large granule."""
    if dim <= preferred:
        return dim
    for g in granules:
        t = (min(preferred, dim) // g) * g
        while t >= g:
            if dim % t == 0:
                return t
            t -= g
    return dim  # no nice divisor: fall back to the full dimension


def _sliced_footprint(tile_m, tile_ff, d_model, x_item, w_item, out_item, out_is_f32):
    b = 0
    b += 2 * tile_m * d_model * x_item          # x tile (double-buffered)
    b += 2 * d_model * tile_ff * w_item         # w1 slice
    b += 2 * tile_ff * d_model * w_item         # w2 slice
    b += 2 * (tile_ff + d_model) * 4            # biases (f32)
    b += 2 * tile_m * d_model * out_item        # out tile
    if not out_is_f32:
        b += tile_m * d_model * 4               # f32 accumulator scratch
    b += tile_m * tile_ff * 4                   # materialized f32 h temp
    b += tile_m * tile_ff * w_item              # h cast copy for 2nd matmul
    return b


def _resident_footprint(tile_m, d_model, d_ff, x_item, w_item, out_item):
    b = 0
    b += 2 * tile_m * d_model * x_item          # x tile
    b += 2 * tile_m * d_model * out_item        # out tile
    b += 2 * 2 * d_model * d_ff * w_item        # W1 + W2 (counted double-buffered, conservative)
    b += 2 * (d_ff + d_model) * 4               # biases
    b += tile_m * d_ff * 4                      # f32 h temp
    b += tile_m * d_ff * w_item                 # h cast copy
    return b


# ------------------------------------ wrapper -------------------------------------

def feed_forward_block(x, w1, b1, w2, b2, *, tile_m=None, tile_ff=None,
                       weights_resident=None, matmul_dtype=None):
    """x: [batch, seq, d_model]; w1: [d_model, d_ff]; w2: [d_ff, d_model]."""
    batch, seq, d_model = x.shape
    d_ff = w1.shape[1]
    M = batch * seq
    out_dtype = x.dtype

    # Optional MXU fast path for f32 inputs on v5e/v6e: cast operands to bf16 for the
    # matmuls; accumulation stays f32, biases stay f32, output dtype unchanged.
    if matmul_dtype is not None:
        x = x.astype(matmul_dtype)
        w1 = w1.astype(matmul_dtype)
        w2 = w2.astype(matmul_dtype)

    x2 = x.reshape(M, d_model)
    b1_2d = b1.reshape(1, d_ff).astype(jnp.float32)
    b2_2d = b2.reshape(1, d_model).astype(jnp.float32)

    x_item = x2.dtype.itemsize
    w_item = w1.dtype.itemsize
    out_item = jnp.dtype(out_dtype).itemsize
    out_is_f32 = jnp.dtype(out_dtype) == jnp.dtype(jnp.float32)

    cap = _vmem_capacity_bytes()
    budget = max(min(cap - (12 << 20), int(cap * 0.80)), 16 << 20)

    # ---- tile_m: big for arithmetic intensity, MXU-aligned, megacore-shardable ----
    if tile_m is None:
        preferred_m = 1024 if cap >= (96 << 20) else 512   # v5e/v6e vs v7x VMEM
        tile_m = _divisor_tile(M, preferred_m)
        if M // tile_m < 2 and M >= 256:
            # Keep grid[0] >= 2 so the "parallel" M axis feeds both v7x TensorCores.
            half = _divisor_tile(M, max(tile_m // 2, 128))
            if half >= 128 and M % half == 0 and M // half >= 2:
                tile_m = half

    # ---- path choice: weights-resident (1-D grid) vs ff-sliced reduction ----
    if weights_resident is None:
        weights_resident = (
            tile_ff is None
            and _resident_footprint(tile_m, d_model, d_ff, x_item, w_item, out_item) <= budget
        )

    if weights_resident:
        footprint = _resident_footprint(tile_m, d_model, d_ff, x_item, w_item, out_item)
        while footprint > budget and tile_m > 128:
            smaller = _divisor_tile(M, tile_m // 2)
            if smaller >= tile_m:
                break
            tile_m = smaller
            footprint = _resident_footprint(tile_m, d_model, d_ff, x_item, w_item, out_item)
    else:
        if tile_ff is None:
            # Wide ff slices amortize accumulator RMW + per-grid-step overhead; shrink
            # ff first, then tile_m, to stay inside the VMEM budget (v7x especially).
            tile_ff = None
            for cand in (2048, 1024, 512, 256, 128):
                t = _divisor_tile(d_ff, cand, granules=(256, 128))
                if d_ff % t == 0 and _sliced_footprint(
                        tile_m, t, d_model, x_item, w_item, out_item, out_is_f32) <= budget:
                    tile_ff = t
                    break
            if tile_ff is None:
                tile_ff = _divisor_tile(d_ff, 256, granules=(256, 128))
                while (_sliced_footprint(tile_m, tile_ff, d_model, x_item, w_item,
                                         out_item, out_is_f32) > budget and tile_m > 128):
                    smaller = _divisor_tile(M, tile_m // 2)
                    if smaller >= tile_m:
                        break
                    tile_m = smaller
        if d_ff % tile_ff != 0:
            # A partial ff slice would accumulate out-of-bounds/padding garbage.
            raise ValueError(f"tile_ff={tile_ff} must divide d_ff={d_ff}")
        footprint = _sliced_footprint(tile_m, tile_ff, d_model, x_item, w_item,
                                      out_item, out_is_f32)

    grid_m = pl.cdiv(M, tile_m)

    # Explicit scoped-VMEM limit from the actual footprint (+ headroom), clamped to chip.
    vmem_limit = int(min(cap * 0.95, max(footprint * 3 // 2, 32 << 20)))
    vmem_limit = int(min(max(vmem_limit, footprint + (4 << 20)), cap - (2 << 20)))

    weight_passes = 1 if weights_resident else grid_m   # weights re-streamed per M tile
    cost = pl.CostEstimate(
        flops=4 * M * d_model * d_ff,
        transcendentals=0,
        bytes_accessed=M * d_model * (x_item + out_item)
        + weight_passes * (w1.size + w2.size) * w_item
        + (d_ff + d_model) * 4,
    )

    if weights_resident:
        out2 = pl.pallas_call(
            _ffn_kernel_resident,
            out_shape=jax.ShapeDtypeStruct((M, d_model), out_dtype),
            grid_spec=pltpu.PrefetchScalarGridSpec(
                num_scalar_prefetch=0,
                grid=(grid_m,),
                in_specs=[
                    pl.BlockSpec((tile_m, d_model), lambda i: (i, 0)),
                    pl.BlockSpec((d_model, d_ff), lambda i: (0, 0)),   # W1 resident
                    pl.BlockSpec((1, d_ff), lambda i: (0, 0)),
                    pl.BlockSpec((d_ff, d_model), lambda i: (0, 0)),   # W2 resident
                    pl.BlockSpec((1, d_model), lambda i: (0, 0)),
                ],
                out_specs=pl.BlockSpec((tile_m, d_model), lambda i: (i, 0)),
            ),
            compiler_params=pltpu.CompilerParams(
                dimension_semantics=("parallel",),
                vmem_limit_bytes=vmem_limit),
            cost_estimate=cost,
        )(x2, w1, b1_2d, w2, b2_2d)
    else:
        grid = (grid_m, d_ff // tile_ff)
        if out_is_f32:
            kernel = _ffn_kernel_sliced_f32out
            scratch = []            # accumulate directly into the resident o_ref block
        else:
            kernel = _ffn_kernel_sliced_acc
            scratch = [pltpu.VMEM((tile_m, d_model), jnp.float32)]
        out2 = pl.pallas_call(
            kernel,
            out_shape=jax.ShapeDtypeStruct((M, d_model), out_dtype),
            grid_spec=pltpu.PrefetchScalarGridSpec(
                num_scalar_prefetch=0,
                grid=grid,
                in_specs=[
                    pl.BlockSpec((tile_m, d_model), lambda i, f: (i, 0)),
                    pl.BlockSpec((d_model, tile_ff), lambda i, f: (0, f)),
                    pl.BlockSpec((1, tile_ff), lambda i, f: (0, f)),
                    pl.BlockSpec((tile_ff, d_model), lambda i, f: (f, 0)),
                    pl.BlockSpec((1, d_model), lambda i, f: (0, 0)),
                ],
                out_specs=pl.BlockSpec((tile_m, d_model), lambda i, f: (i, 0)),
                scratch_shapes=scratch,
            ),
            compiler_params=pltpu.CompilerParams(
                dimension_semantics=("parallel", "arbitrary"),
                vmem_limit_bytes=vmem_limit),
            cost_estimate=cost,
        )(x2, w1, b1_2d, w2, b2_2d)

    return out2.reshape(batch, seq, d_model)


def init_params(key, d_model, d_ff, dtype=jnp.float32):
    # Mirrors nn.Linear init shapes; weights stored transposed as [in, out].
    k1, k2, k3, k4 = jax.random.split(key, 4)
    lim1 = 1.0 / (d_model ** 0.5)
    lim2 = 1.0 / (d_ff ** 0.5)
    w1 = jax.random.uniform(k1, (d_model, d_ff), dtype, -lim1, lim1)
    b1 = jax.random.uniform(k2, (d_ff,), dtype, -lim1, lim1)
    w2 = jax.random.uniform(k3, (d_ff, d_model), dtype, -lim2, lim2)
    b2 = jax.random.uniform(k4, (d_model,), dtype, -lim2, lim2)
    return w1, b1, w2, b2


if __name__ == "__main__":
    # Small but lane-dense shapes (d_model multiple of 128) so output stores are unmasked.
    batch, seq, d_model, d_ff = 2, 128, 128, 512
    key = jax.random.PRNGKey(0)
    kx, kp = jax.random.split(key)
    x = jax.random.normal(kx, (batch, seq, d_model), jnp.float32)
    w1, b1, w2, b2 = init_params(kp, d_model, d_ff)

    ref = jnp.maximum(x @ w1 + b1, 0.0) @ w2 + b2

    # 1) Auto path: weights fit VMEM -> weights-resident 1-D grid over M (megacore-split).
    out = jax.block_until_ready(feed_forward_block(x, w1, b1, w2, b2))
    assert out.shape == (batch, seq, d_model)
    assert jnp.allclose(out, ref, atol=1e-4, rtol=1e-4)

    # 2) Forced ff-sliced reduction path, f32 output -> accumulate directly into o_ref.
    out_s = jax.block_until_ready(
        feed_forward_block(x, w1, b1, w2, b2, tile_m=128, tile_ff=256,
                           weights_resident=False))
    assert jnp.allclose(out_s, ref, atol=1e-4, rtol=1e-4)

    # 3) bf16 activations/weights (f32 accumulation), sliced path with f32 acc scratch.
    out_bf16 = jax.block_until_ready(
        feed_forward_block(x.astype(jnp.bfloat16),
                           w1.astype(jnp.bfloat16), b1,
                           w2.astype(jnp.bfloat16), b2,
                           tile_ff=256, weights_resident=False))
    assert jnp.allclose(out_bf16.astype(jnp.float32), ref, atol=5e-2, rtol=5e-2)

    # 4) f32 inputs with bf16 MXU fast path (v5e/v6e): cast operands, keep f32 epilogue/out.
    out_fast = jax.block_until_ready(
        feed_forward_block(x, w1, b1, w2, b2, matmul_dtype=jnp.bfloat16))
    assert jnp.allclose(out_fast, ref, atol=5e-2, rtol=5e-2)

    print("KERNEL_OK")
</pallas_src>

<mosaic_0001>
module attributes {stable_mosaic.version = 11 : i64} {
  func.func @_ffn_kernel_resident(%arg0: i32, %arg1: memref<128x128xf32, #tpu.memory_space<vmem>>, %arg2: memref<128x512xf32, #tpu.memory_space<vmem>>, %arg3: memref<1x512xf32, #tpu.memory_space<vmem>>, %arg4: memref<512x128xf32, #tpu.memory_space<vmem>>, %arg5: memref<1x128xf32, #tpu.memory_space<vmem>>, %arg6: memref<128x128xf32, #tpu.memory_space<vmem>>) attributes {dimension_semantics = [#tpu.dimension_semantics<parallel>], iteration_bounds = array<i64: 2>, scalar_prefetch = 0 : i64, scratch_operands = 0 : i64, tpu.core_type = #tpu.core_type<tc>, window_params = [{transform_indices = @transform_0, window_bounds = array<i64: 128, 128>}, {pipeline_mode = #tpu.pipeline_mode<synchronous>, transform_indices = @transform_1, window_bounds = array<i64: 128, 512>}, {pipeline_mode = #tpu.pipeline_mode<synchronous>, transform_indices = @transform_2, window_bounds = array<i64: 1, 512>}, {pipeline_mode = #tpu.pipeline_mode<synchronous>, transform_indices = @transform_3, window_bounds = array<i64: 512, 128>}, {pipeline_mode = #tpu.pipeline_mode<synchronous>, transform_indices = @transform_4, window_bounds = array<i64: 1, 128>}, {transform_indices = @transform_5, window_bounds = array<i64: 128, 128>}]} {
    %c0 = arith.constant 0 : index
    %c0_0 = arith.constant 0 : index
    %0 = vector.load %arg1[%c0, %c0_0] : memref<128x128xf32, #tpu.memory_space<vmem>>, vector<128x128xf32>
    %c0_1 = arith.constant 0 : index
    %c0_2 = arith.constant 0 : index
    %1 = vector.load %arg2[%c0_1, %c0_2] : memref<128x512xf32, #tpu.memory_space<vmem>>, vector<128x512xf32>
    %cst = arith.constant dense<0.000000e+00> : vector<128x512xf32>
    %2 = tpu.matmul %0, %1, %cst {dimension_numbers = #tpu.dot_dimension_numbers<[1], [0], [0], [1], [0, 0, 1, 1], [], []>} : vector<128x128xf32>, vector<128x512xf32>, vector<128x512xf32> -> vector<128x512xf32>
    %c0_3 = arith.constant 0 : index
    %c0_4 = arith.constant 0 : index
    %3 = vector.load %arg3[%c0_3, %c0_4] : memref<1x512xf32, #tpu.memory_space<vmem>>, vector<1x512xf32>
    %4 = vector.broadcast %3 : vector<1x512xf32> to vector<128x512xf32>
    %5 = arith.addf %2, %4 : vector<128x512xf32>
    %cst_5 = arith.constant 0.000000e+00 : f32
    %6 = vector.broadcast %cst_5 : f32 to vector<128x512xf32>
    %7 = arith.maximumf %5, %6 : vector<128x512xf32>
    %c0_6 = arith.constant 0 : index
    %c0_7 = arith.constant 0 : index
    %8 = vector.load %arg4[%c0_6, %c0_7] : memref<512x128xf32, #tpu.memory_space<vmem>>, vector<512x128xf32>
    %cst_8 = arith.constant dense<0.000000e+00> : vector<128x128xf32>
    %9 = tpu.matmul %7, %8, %cst_8 {dimension_numbers = #tpu.dot_dimension_numbers<[1], [0], [0], [1], [0, 0, 1, 1], [], []>} : vector<128x512xf32>, vector<512x128xf32>, vector<128x128xf32> -> vector<128x128xf32>
    %c0_9 = arith.constant 0 : index
    %c0_10 = arith.constant 0 : index
    %10 = vector.load %arg5[%c0_9, %c0_10] : memref<1x128xf32, #tpu.memory_space<vmem>>, vector<1x128xf32>
    %11 = vector.broadcast %10 : vector<1x128xf32> to vector<128x128xf32>
    %12 = arith.addf %9, %11 : vector<128x128xf32>
    %c0_11 = arith.constant 0 : index
    %c0_12 = arith.constant 0 : index
    %13 = vector.load %arg6[%c0_11, %c0_12] : memref<128x128xf32, #tpu.memory_space<vmem>>, vector<128x128xf32>
    tpu.vector_store %arg6[%c0_11, %c0_12], %12 {strides = array<i32>} : memref<128x128xf32, #tpu.memory_space<vmem>>, vector<128x128xf32>,
    return
  }
  func.func @transform_0(%arg0: i32) -> (i32, i32) {
    %c0_i32 = arith.constant 0 : i32
    %c0_i32_0 = arith.constant 0 : i32
    return %arg0, %c0_i32 : i32, i32
  }
  func.func @transform_1(%arg0: i32) -> (i32, i32) {
    %c0_i32 = arith.constant 0 : i32
    %c0_i32_0 = arith.constant 0 : i32
    %c0_i32_1 = arith.constant 0 : i32
    return %c0_i32, %c0_i32_0 : i32, i32
  }
  func.func @transform_2(%arg0: i32) -> (i32, i32) {
    %c0_i32 = arith.constant 0 : i32
    %c0_i32_0 = arith.constant 0 : i32
    %c0_i32_1 = arith.constant 0 : i32
    return %c0_i32, %c0_i32_0 : i32, i32
  }
  func.func @transform_3(%arg0: i32) -> (i32, i32) {
    %c0_i32 = arith.constant 0 : i32
    %c0_i32_0 = arith.constant 0 : i32
    %c0_i32_1 = arith.constant 0 : i32
    return %c0_i32, %c0_i32_0 : i32, i32
  }
  func.func @transform_4(%arg0: i32) -> (i32, i32) {
    %c0_i32 = arith.constant 0 : i32
    %c0_i32_0 = arith.constant 0 : i32
    %c0_i32_1 = arith.constant 0 : i32
    return %c0_i32, %c0_i32_0 : i32, i32
  }
  func.func @transform_5(%arg0: i32) -> (i32, i32) {
    %c0_i32 = arith.constant 0 : i32
    %c0_i32_0 = arith.constant 0 : i32
    return %arg0, %c0_i32 : i32, i32
  }
}

</mosaic_0001>

<bundles_post_ra>
// kernel: tpu_custom_call.1
= control target key start
LH: loop header
LB: loop body
LE: loop exit
PB: predicated region body
PF: predicated region fallthrough
CT: control target
= control target key end

     0   :  { %10 = vsyncpa [#allocation3], 0  ;;  %s2236_s0 = inlined_call_operand.hbm [shape: f32[256,128], index: 0, kind: input, shape index: {}]   ;;  %s2237_s1 = inlined_call_operand.hbm [shape: f32[128,512], index: 1, kind: input, shape index: {}]   ;;  %s2238_s2 = inlined_call_operand.vmem [shape: f32[1,512], index: 2, kind: input, shape index: {}]   ;;  %s2239_s3 = inlined_call_operand.hbm [shape: f32[512,128], index: 3, kind: input, shape index: {}]   ;;  %s2240_s4 = inlined_call_operand.vmem [shape: f32[1,128], index: 4, kind: input, shape index: {}]   ;;  %s2241_s5 = inlined_call_operand.hbm [shape: f32[256,128], index: 5, kind: output, shape index: {}]  }
   0x1   :  { %12 = vsyncpa [#allocation3 + $0x1], 0 }
   0x2   :  { %13 = vsyncpa [#allocation6], 0 }
   0x3   :  { %14 = vsyncpa [#allocation4], 0 }
   0x4   :  { %16 = vsyncpa [#allocation4 + $0x1], 0  ;;  %s1827_s18 = smov 0   ;;  %s1829_s19 = smov 0  }
   0x5   :  { %s1831_s20 = smov 0   ;;  %s1833_s21 = smov 0  }
   0x6 LB: > { %s1848_s22 = sadd.s32 4294967295, %s1784_s21   ;;  %s1245_s23 = sadd.s32 4294967294, %s1784_s21   ;;  %s1784_s21 = sphi %s1833_s21, %s2261_s21   ;;  %s1780_s20 = sphi %s1831_s20, %s2260_s20   ;;  %s1776_s19 = sphi %s1829_s19, %s2259_s19   ;;  %s1772_s18 = sphi %s1827_s18, %s2258_s18  }
   0x7   : > { %p42_p0 = scmp.ne.s32.totalorder %s1776_s19, %s1772_s18  ;;  %p2242_p1 = scmp.eq.s32.totalorder %s1848_s22, 0 }
   0x8   : > { %p156_p3 = scmp.eq.s32.totalorder %s1245_s23, 1  ;;  %p1246_p5 = scmp.ge.s32.totalorder %s1784_s21, 1 }
   0x9   : > { %p1857_p4 = por %p2242_p1, %p42_p0  ;;  %p163_p7 = scmp.lt.s32.totalorder %s1784_s21, 3 }
   0xa   : > { %p1862_p6 = por %p156_p3, %p42_p0  ;;  %s1786_s27 = smov [#allocation5]  }
   0xb   : > { %s2245_s24 = scalar_select %p1857_p4, 1, 0 }
   0xc   : > { %s2246_s25 = scalar_select %p1862_p6, 1, 0 }
   0xd   : > { %p1867_p8 = pnand %p1246_p5, %p163_p7  ;;  %s175_s28 = sshll.u32 %s1786_s27, 4  ;;  %s1871_s28 = int_to_ptr.vmem [resolvable:$true] %s175_s28 }
   0xe   : > { %s1787_s30 = smov [#allocation7]   ;;  %s1628_s9 = scalar_lea.hbm %s2237_s1, 8192 }
   0xf   : > { %p1566_p9 = pneg %p1867_p8  ;;  %s191_s6 = sshll.u32 %s1787_s30, 4  ;;  %s1882_s6 = int_to_ptr.vmem [resolvable:$true] %s191_s6 }
  0x10   : > { %p1629_p12 = scmp.ne.s32.totalorder %s2237_s1, %s1628_s9  ;;  %p1635_p5 = scmp.lt.u32.totalorder %s1628_s9, %s2237_s1 }
  0x11   : > { %p1878_p11 = pnand %p1566_p9, %p2242_p1 }
  0x13   : > { %p1630_p13 = pneg %p1878_p11 }
  0x15   : > { %p1631_p0 = pnand %p1630_p13, %p1629_p12 }
  0x17   : > { %p1632_p3 = pneg %p1631_p0 }
  0x19   : > { %p1637_p7 = pnand %p1635_p5, %p1632_p3 }
  0x1b   : > { %1640 = shalt.err (!%p1637_p7)
}
  0x1c   : > { %s1641_s14 = scalar_lea.vmem %s1871_s28, 8192  ;;  %p1649_p2 = scmp.lt.s32.totalorder %s1871_s28, %s1871_s28 }
  0x1d   : > { %p1642_p9 = scmp.ne.s32.totalorder %s1871_s28, %s1641_s14  ;;  %p1650_p12 = scmp.lt.s32.totalorder %s1641_s14, %s1641_s14 }
  0x1f   : > { %p1644_p10 = pnand %p1642_p9, %p1630_p13  ;;  %p1651_p0 = por %p1650_p12, %p1649_p2 }
  0x21   : > { %p1645_p1 = pneg %p1644_p10 }
  0x23   : > { %p1652_p6 = pnand %p1651_p0, %p1645_p1 }
  0x25   : > { %1655 = shalt.err (!%p1652_p6)
}
  0x26   : > { %s1788_s15 = smov 512   ;;  %s1789_s16 = smov 32  }
  0x27   : > { %1569 = dma.hbm_to_vmem [thread:$0]  (!%p1878_p11), %s2237_s1, 8192, %s1871_s28, [#allocation6], %s1788_s15, %s1788_s15, %s1789_s16  }
  0x28   : > { %s1656_s7 = scalar_lea.hbm %s2239_s3, 8192 }
  0x29   : > { %p1657_p2 = scmp.ne.s32.totalorder %s2239_s3, %s1656_s7  ;;  %p1663_p10 = scmp.lt.u32.totalorder %s1656_s7, %s2239_s3 }
  0x2b   : > { %p1659_p1 = pnand %p1657_p2, %p1630_p13 }
  0x2d   : > { %p1660_p6 = pneg %p1659_p1 }
  0x2f   : > { %p1665_p3 = pnand %p1663_p10, %p1660_p6 }
  0x31   : > { %1668 = shalt.err (!%p1665_p3)
}
  0x32   : > { %s1669_s28 = scalar_lea.vmem %s1882_s6, 8192  ;;  %p1677_p12 = scmp.lt.s32.totalorder %s1882_s6, %s1882_s6 }
  0x33   : > { %p1670_p5 = scmp.ne.s32.totalorder %s1882_s6, %s1669_s28  ;;  %p1678_p0 = scmp.lt.s32.totalorder %s1669_s28, %s1669_s28 }
  0x35   : > { %p1672_p7 = pnand %p1670_p5, %p1630_p13  ;;  %p1679_p2 = por %p1678_p0, %p1677_p12 }
  0x37   : > { %p1673_p9 = pneg %p1672_p7 }
  0x39   : > { %p1680_p1 = pnand %p1679_p2, %p1673_p9 }
  0x3b   : > { %1683 = shalt.err (!%p1680_p1)
}
  0x3c   : > { %s1790_s12 = smov 128   ;;  %s1791_s13 = smov 8  }
  0x3d   : > { %1572 = dma.hbm_to_vmem [thread:$0]  (!%p1878_p11), %s2239_s3, 8192, %s1882_s6, [#allocation6], %s1790_s12, %s1790_s12, %s1791_s13  }
  0x3e   : > { %s1940_s16 = sadd.s32 1, %s1784_s21   ;;  %s29_s23 = sadd.s32 1, %s1780_s20 }
  0x3f   : > { %s26_s17 = ssub.s32 %s1784_s21, %s1940_s16  ;;  %p36_p6 = scmp.ne.s32.totalorder %s1780_s20, %s1776_s19 }
  0x40   : > { %p27_p13 = scmp.eq.s32.totalorder %s26_s17, 0  ;;  %p37_p10 = scmp.eq.s32.totalorder %s1784_s21, 0 }
  0x41   : > { %p2249_p5 = scmp.eq.s32.totalorder %s1848_s22, 1  ;;  %p1583_p9 = scmp.lt.s32.totalorder %s1784_s21, 2 }
  0x42   : > { %s1949_s27 = scalar_select %p27_p13, %s1780_s20, %s29_s23  }
  0x43   : > { %p38_p3 = por %p37_p10, %p36_p6  ;;  %p1953_p7 = por %p2249_p5, %p36_p6 }
  0x44   : > { %s208_s30 = sand.u32 1, %s1780_s20   ;;  %s1264_s6 = sshll.u32 %s1784_s21, 11 }
  0x45   : > { %s2250_s29 = scalar_select %p1953_p7, 1, 0 }
  0x46   : > { %s1250_s7 = sshll.u32 %s208_s30, 7  ;;  %s1963_s10 = scalar_lea.hbm %s2236_s0, %s1264_s6 }
  0x47   : > { %s212_s11 = scalar_lea.vmem [#allocation2], %s1250_s7  ;;  %p1967_p11 = pnand %p1583_p9, %p38_p3 }
  0x48   : > { %s219_s28 = sshll.u32 %s212_s11, 4  ;;  %s1971_s15 = scalar_lea.sflag [#allocation3], %s208_s30  ;;  %s1965_s28 = int_to_ptr.vmem [resolvable:$true] %s219_s28 }
  0x49   : > { %s1684_s17 = scalar_lea.hbm %s1963_s10, 2048  ;;  %p1686_p0 = pneg %p1967_p11 }
  0x4a   : > { %p1685_p12 = scmp.ne.s32.totalorder %s1963_s10, %s1684_s17  ;;  %s1689_s6 = scalar_lea.hbm %s2236_s0, 4096 }
  0x4b   : > { %p1690_p13 = scmp.lt.u32.totalorder %s1963_s10, %s2236_s0  ;;  %p1691_p6 = scmp.lt.u32.totalorder %s1689_s6, %s1684_s17 }
  0x4c   : > { %p1687_p2 = pnand %p1686_p0, %p1685_p12  ;;  %p1693_p3 = scmp.lt.u32.totalorder %s1684_s17, %s1963_s10 }
  0x4d   : > { %p1692_p10 = por %p1691_p6, %p1690_p13 }
  0x4e   : > { %p1688_p1 = pneg %p1687_p2 }
  0x4f   : > { %p1694_p5 = por %p1693_p3, %p1692_p10 }
  0x51   : > { %p1695_p9 = pnand %p1694_p5, %p1688_p1 }
  0x53   : > { %1698 = shalt.err (!%p1695_p9)
}
  0x54   : > { %s1699_s30 = scalar_lea.vmem %s1965_s28, 2048  ;;  %s1792_s11 = smov [#allocation2]  }
  0x55   : > { %p1700_p12 = scmp.ne.s32.totalorder %s1965_s28, %s1699_s30  ;;  %s1704_s23 = sshll.u32 %s1792_s11, 4  ;;  %s1705_s23 = int_to_ptr.vmem [resolvable:$false] %s1704_s23 }
  0x56   : > { %s1706_s7 = scalar_lea.vmem %s1705_s23, 4096  ;;  %p1707_p4 = scmp.lt.s32.totalorder %s1965_s28, %s1705_s23 }
  0x57   : > { %p1702_p2 = pnand %p1700_p12, %p1686_p0  ;;  %p1708_p13 = scmp.lt.s32.totalorder %s1706_s7, %s1699_s30 }
  0x59   : > { %p1703_p7 = pneg %p1702_p2  ;;  %p1709_p6 = por %p1708_p13, %p1707_p4 }
  0x5b   : > { %p1710_p10 = pnand %p1709_p6, %p1703_p7 }
  0x5d   : > { %1713 = shalt.err (!%p1710_p10)
}
  0x5e   : > { %1576 = dma.hbm_to_vmem [thread:$0]  (!%p1967_p11), %s1963_s10, 2048, %s1965_s28, %s1971_s15, %s1790_s12, %s1790_s12, %s1791_s13  }
  0x5f   : > { %231 = sbr.rel (%p1867_p8) target bundleno = 654 (0x28e), region = 40  ;;  %s2005_s17 = sand.u32 (!%p1867_p8), 1, %s1776_s19  }
  0x60   : > { %s1254_s6 = sshll.u32 (!%p1867_p8), %s2005_s17, 7  ;;  %s234_s8 = scalar_lea.sflag (!%p1867_p8), [#allocation3], %s2005_s17 }
  0x61   : > { %s2011_s14 = scalar_lea.vmem (!%p1867_p8), [#allocation2], %s1254_s6  ;;  %p2252_p4 = scmp.ne.s32.totalorder (!%p1867_p8), %s2245_s24, 0 }
  0x66   : > { %1759 = dma.done.wait (%p2252_p4), %s234_s8, 2048  }
  0x67   : > { %1761 = vsyncadd (%p2252_p4), %s234_s8, 4294965248  ;;  %p2253_p7 = scmp.eq.s32.totalorder %s1848_s22, 0 }
  0x69   : > { %1763 = dma.done.wait (%p2253_p7), [#allocation6], 16384   ;;  %p2254_p8 = pmov %p2253_p7 }
  0x6a   : > { %v1793_v0 = vmov 0.0   ;;  %v291_v1 = vld [vmem:[#allocation5 + $0x8] sm:$0xff]  ;;  %v293_v3 = vld [vmem:[#allocation5 + $0x18] sm:$0xff]  ;;  %v290_v6 = vld [vmem:[#allocation5] sm:$0xff]  ;;  %s2152_s10 = scalar_lea.vmem [#allocation8], %s1254_s6  ;;  %s1265_s28 = sshll.u32 %s1848_s22, 11 }
  0x6b   : > { %1765 = vsyncadd (%p2254_p8), [#allocation6], 4294950912  ;;  %440 = vmatprep.mubr.f32.mxu0 %v1793_v0  ;;  %601 = vmatprep.mubr.f32.mxu1 %v1793_v0  ;;  %v295_v2 = vld [vmem:[#allocation5 + $0x28] sm:$0xff]  ;;  %v297_v5 = vld [vmem:[#allocation5 + $0x38] sm:$0xff]  ;;  %s1153_s15 = sshll.u32 %s2152_s10, 4  ;;  %s2189_s11 = scalar_lea.hbm %s2241_s5, %s1265_s28  ;;  %s2191_s15 = int_to_ptr.vmem [resolvable:$true] %s1153_s15 }
  0x6c   : > { %v1426_v4 = vpack.c.bf16 %v295_v2, %v291_v1  ;;  %v294_v7 = vld [vmem:[#allocation5 + $0x20] sm:$0xff]  ;;  %v1458_v8 = vpack.c.bf16 %v297_v5, %v293_v3  ;;  %v292_v10 = vld [vmem:[#allocation5 + $0x10] sm:$0xff]  ;;  %v299_v12 = vld [vmem:[#allocation5 + $0x48] sm:$0xff]  ;;  %s1140_s23 = scalar_lea.sflag [#allocation4], %s2005_s17  ;;  %s1714_s7 = scalar_lea.vmem %s2191_s15, 2048 }
  0x6d   : > { %v1428_v9 = vpack.c.bf16 %v294_v7, %v290_v6  ;;  %v296_v11 = vld [vmem:[#allocation5 + $0x30] sm:$0xff]  ;;  %v303_v14 = vld [vmem:[#allocation5 + $0x68] sm:$0xff]  ;;  %v301_v15 = vld [vmem:[#allocation5 + $0x58] sm:$0xff]  ;;  %p1715_p11 = scmp.ne.s32.totalorder %s2191_s15, %s1714_s7  ;;  %p2255_p0 = scmp.ne.s32.totalorder %s2250_s29, 0 }
  0x6e   : > { %1427 = vmatprep.subr.bf16.mxu0 %v1426_v4  ;;  %v1460_v13 = vpack.c.bf16 %v296_v11, %v292_v10  ;;  %v305_v16 = vld [vmem:[#allocation5 + $0x78] sm:$0xff]  ;;  %1459 = vmatprep.subr.bf16.mxu1 %v1458_v8  ;;  %v1430_v17 = vpack.c.bf16 %v303_v14, %v299_v12  ;;  %v298_v19 = vld [vmem:[#allocation5 + $0x40] sm:$0xff]  ;;  %v300_v21 = vld [vmem:[#allocation5 + $0x50] sm:$0xff]  ;;  %s1794_s22 = smov [#allocation8]  }
  0x6f   : > { %1429 = vmatpush1.bf16.msra.mxu0 %v1428_v9  ;;  %v1462_v18 = vpack.c.bf16 %v305_v16, %v301_v15  ;;  %v302_v20 = vld [vmem:[#allocation5 + $0x60] sm:$0xff]  ;;  %v304_v23 = vld [vmem:[#allocation5 + $0x70] sm:$0xff]  ;;  %v307_v24 = vld [vmem:[#allocation5 + $0x88] sm:$0xff]  ;;  %p1716_p1 = pnand %p1715_p11, %p2255_p0  ;;  %s1718_s6 = sshll.u32 %s1794_s22, 4  ;;  %s1719_s6 = int_to_ptr.vmem [resolvable:$false] %s1718_s6 }
  0x70   : > { %1461 = vmatpush1.bf16.msra.mxu1 %v1460_v13  ;;  %v1432_v22 = vpack.c.bf16 %v302_v20, %v298_v19  ;;  %v311_v25 = vld [vmem:[#allocation5 + $0xa8] sm:$0xff]  ;;  %1431 = vmatprep.subr.bf16.mxu0 %v1430_v17  ;;  %v1464_v26 = vpack.c.bf16 %v304_v23, %v300_v21  ;;  %v309_v28 = vld [vmem:[#allocation5 + $0x98] sm:$0xff]  ;;  %v306_v30 = vld [vmem:[#allocation5 + $0x80] sm:$0xff]  ;;  %s1720_s8 = scalar_lea.vmem %s1719_s6, 4096  ;;  %p1721_p5 = scmp.lt.s32.totalorder %s2191_s15, %s1719_s6 }
  0x71   : > { %1463 = vmatprep.subr.bf16.mxu1 %v1462_v18  ;;  %v1434_v27 = vpack.c.bf16 %v311_v25, %v307_v24  ;;  %v313_v29 = vld [vmem:[#allocation5 + $0xb8] sm:$0xff]  ;;  %v310_v32 = vld [vmem:[#allocation5 + $0xa0] sm:$0xff]  ;;  %v308_v33 = vld [vmem:[#allocation5 + $0x90] sm:$0xff]  ;;  %p1717_p3 = pneg %p1716_p1  ;;  %p1722_p9 = scmp.lt.s32.totalorder %s1720_s8, %s1714_s7 }
  0x72   : > { %v1466_v31 = vpack.c.bf16 %v313_v29, %v309_v28  ;;  %v312_v34 = vld [vmem:[#allocation5 + $0xb0] sm:$0xff]  ;;  %v1436_v35 = vpack.c.bf16 %v310_v32, %v306_v30  ;;  %v315_v36 = vld [vmem:[#allocation5 + $0xc8] sm:$0xff]  ;;  %v317_v38 = vld [vmem:[#allocation5 + $0xd8] sm:$0xff] }
  0x73   : > { %1433 = vmatpush1.bf16.msra.mxu0 %v1432_v22  ;;  %v319_v37 = vld [vmem:[#allocation5 + $0xe8] sm:$0xff]  ;;  %v1468_v39 = vpack.c.bf16 %v312_v34, %v308_v33  ;;  %v321_v41 = vld [vmem:[#allocation5 + $0xf8] sm:$0xff]  ;;  %v314_v42 = vld [vmem:[#allocation5 + $0xc0] sm:$0xff]  ;;  %p1723_p12 = por %p1722_p9, %p1721_p5 }
  0x74   : > { %1465 = vmatpush1.bf16.msra.mxu1 %v1464_v26  ;;  %1435 = vmatprep.subr.bf16.mxu0 %v1434_v27  ;;  %v1438_v40 = vpack.c.bf16 %v319_v37, %v315_v36  ;;  %v318_v43 = vld [vmem:[#allocation5 + $0xe0] sm:$0xff]  ;;  %v1470_v44 = vpack.c.bf16 %v321_v41, %v317_v38  ;;  %v316_v45 = vld [vmem:[#allocation5 + $0xd0] sm:$0xff]  ;;  %v323_v47 = vld [vmem:[#allocation5 + $0x108] sm:$0xff] }
  0x75   : > { %1467 = vmatprep.subr.bf16.mxu1 %v1466_v31  ;;  %v320_v46 = vld [vmem:[#allocation5 + $0xf0] sm:$0xff]  ;;  %v327_v48 = vld [vmem:[#allocation5 + $0x128] sm:$0xff]  ;;  %v325_v49 = vld [vmem:[#allocation5 + $0x118] sm:$0xff]  ;;  %v1440_v51 = vpack.c.bf16 %v318_v43, %v314_v42  ;;  %p1724_p2 = pnand %p1723_p12, %p1717_p3 }
  0x76   : > { %v329_v50 = vld [vmem:[#allocation5 + $0x138] sm:$0xff]  ;;  %v1472_v52 = vpack.c.bf16 %v320_v46, %v316_v45  ;;  %v1442_v53 = vpack.c.bf16 %v327_v48, %v323_v47  ;;  %v322_v54 = vld [vmem:[#allocation5 + $0x100] sm:$0xff]  ;;  %v324_v56 = vld [vmem:[#allocation5 + $0x110] sm:$0xff] }
  0x77   : > { %1437 = vmatpush1.bf16.msra.mxu0 %v1436_v35  ;;  %v326_v55 = vld [vmem:[#allocation5 + $0x120] sm:$0xff]  ;;  %v1474_v57 = vpack.c.bf16 %v329_v50, %v325_v49  ;;  %v328_v58 = vld [vmem:[#allocation5 + $0x130] sm:$0xff]  ;;  %v331_v59 = vld [vmem:[#allocation5 + $0x148] sm:$0xff] }
  0x78   : > { %1469 = vmatpush1.bf16.msra.mxu1 %v1468_v39  ;;  %1439 = vmatprep.subr.bf16.mxu0 %v1438_v40  ;;  %v335_v60 = vld [vmem:[#allocation5 + $0x168] sm:$0xff]  ;;  %v333_v61 = vld [vmem:[#allocation5 + $0x158] sm:$0xff]  ;;  %v1444_v63 = vpack.c.bf16 %v326_v55, %v322_v54  ;;  %v1476_v1 = vpack.c.bf16 %v328_v58, %v324_v56  ;;  %v330_v3 = vld [vmem:[#allocation5 + $0x140] sm:$0xff] }
  0x79   : > { %1471 = vmatprep.subr.bf16.mxu1 %v1470_v44  ;;  %v337_v62 = vld [vmem:[#allocation5 + $0x178] sm:$0xff]  ;;  %v1446_v2 = vpack.c.bf16 %v335_v60, %v331_v59  ;;  %v334_v4 = vld [vmem:[#allocation5 + $0x160] sm:$0xff]  ;;  %v332_v5 = vld [vmem:[#allocation5 + $0x150] sm:$0xff] }
  0x7a   : > { %v1478_v6 = vpack.c.bf16 %v337_v62, %v333_v61  ;;  %v336_v7 = vld [vmem:[#allocation5 + $0x170] sm:$0xff]  ;;  %v339_v8 = vld [vmem:[#allocation5 + $0x188] sm:$0xff]  ;;  %v341_v10 = vld [vmem:[#allocation5 + $0x198] sm:$0xff]  ;;  %v1448_v12 = vpack.c.bf16 %v334_v4, %v330_v3 }
  0x7b   : > { %1441 = vmatpush1.bf16.msra.mxu0 %v1440_v51  ;;  %v343_v9 = vld [vmem:[#allocation5 + $0x1a8] sm:$0xff]  ;;  %v345_v11 = vld [vmem:[#allocation5 + $0x1b8] sm:$0xff]  ;;  %v1480_v13 = vpack.c.bf16 %v336_v7, %v332_v5  ;;  %v338_v15 = vld [vmem:[#allocation5 + $0x180] sm:$0xff] }
  0x7c   : > { %1473 = vmatpush1.bf16.msra.mxu1 %v1472_v52  ;;  %1443 = vmatprep.subr.bf16.mxu0 %v1442_v53  ;;  %v1450_v14 = vpack.c.bf16 %v343_v9, %v339_v8  ;;  %v342_v16 = vld [vmem:[#allocation5 + $0x1a0] sm:$0xff]  ;;  %v340_v17 = vld [vmem:[#allocation5 + $0x190] sm:$0xff]  ;;  %v1482_v18 = vpack.c.bf16 %v345_v11, %v341_v10  ;;  %v347_v20 = vld [vmem:[#allocation5 + $0x1c8] sm:$0xff] }
  0x7d   : > { %1475 = vmatprep.subr.bf16.mxu1 %v1474_v57  ;;  %v344_v19 = vld [vmem:[#allocation5 + $0x1b0] sm:$0xff]  ;;  %v351_v21 = vld [vmem:[#allocation5 + $0x1e8] sm:$0xff]  ;;  %v349_v22 = vld [vmem:[#allocation5 + $0x1d8] sm:$0xff]  ;;  %v1452_v24 = vpack.c.bf16 %v342_v16, %v338_v15 }
  0x7e   : > { %v353_v23 = vld [vmem:[#allocation5 + $0x1f8] sm:$0xff]  ;;  %v1484_v25 = vpack.c.bf16 %v344_v19, %v340_v17  ;;  %v1454_v26 = vpack.c.bf16 %v351_v21, %v347_v20  ;;  %v346_v27 = vld [vmem:[#allocation5 + $0x1c0] sm:$0xff]  ;;  %v348_v30 = vld [vmem:[#allocation5 + $0x1d0] sm:$0xff] }
  0x7f   : > { %1445 = vmatpush1.bf16.msra.mxu0 %v1444_v63  ;;  %v350_v28 = vld [vmem:[#allocation5 + $0x1e0] sm:$0xff]  ;;  %v1486_v29 = vpack.c.bf16 %v353_v23, %v349_v22  ;;  %v352_v31 = vld [vmem:[#allocation5 + $0x1f0] sm:$0xff]  ;;  %v779_v33 = vld [vmem:[#allocation7 + $0x88] sm:$0xff] }
  0x80   : > { %1477 = vmatpush1.bf16.msra.mxu1 %v1476_v1  ;;  %1447 = vmatprep.subr.bf16.mxu0 %v1446_v2  ;;  %v778_v32 = vld [vmem:[#allocation7 + $0x80] sm:$0xff]  ;;  %v1456_v34 = vpack.c.bf16 %v350_v28, %v346_v27  ;;  %v811_v36 = vld [vmem:[#allocation7 + $0x188] sm:$0xff]  ;;  %v1488_v37 = vpack.c.bf16 %v352_v31, %v348_v30  ;;  %v780_v44 = vld [vmem:[#allocation7 + $0x90] sm:$0xff] }
  0x81   : > { %1479 = vmatprep.subr.bf16.mxu1 %v1478_v6  ;;  %v810_v35 = vld [vmem:[#allocation7 + $0x180] sm:$0xff]  ;;  %v1490_v38 = vpack.c.bf16 %v779_v33, %v778_v32  ;;  %v763_v40 = vld [vmem:[#allocation7 + $0x8] sm:$0xff]  ;;  %v781_v45 = vld [vmem:[#allocation7 + $0x98] sm:$0xff] }
  0x82   : > { %v762_v39 = vld [vmem:[#allocation7] sm:$0xff]  ;;  %v1522_v41 = vpack.c.bf16 %v811_v36, %v810_v35  ;;  %v795_v43 = vld [vmem:[#allocation7 + $0x108] sm:$0xff]  ;;  %v812_v47 = vld [vmem:[#allocation7 + $0x190] sm:$0xff]  ;;  %v1494_v51 = vpack.c.bf16 %v781_v45, %v780_v44 }
  0x83   : > { %1449 = vmatpush1.bf16.msra.mxu0 %v1448_v12  ;;  %v794_v42 = vld [vmem:[#allocation7 + $0x100] sm:$0xff]  ;;  %v813_v48 = vld [vmem:[#allocation7 + $0x198] sm:$0xff]  ;;  %v1492_v49 = vpack.c.bf16 %v763_v40, %v762_v39  ;;  %v764_v52 = vld [vmem:[#allocation7 + $0x10] sm:$0xff] }
  0x84   : > { %1481 = vmatpush1.bf16.msra.mxu1 %v1480_v13  ;;  %1451 = vmatprep.subr.bf16.mxu0 %v1450_v14  ;;  %v274_v46 = vld [vmem:[%s2011_s14] sm:$0xff]  ;;  %v1524_v50 = vpack.c.bf16 %v795_v43, %v794_v42  ;;  %v765_v53 = vld [vmem:[#allocation7 + $0x18] sm:$0xff]  ;;  %v796_v54 = vld [vmem:[#allocation7 + $0x110] sm:$0xff]  ;;  %v1526_v55 = vpack.c.bf16 %v813_v48, %v812_v47 }
  0x85   : > { %1483 = vmatprep.subr.bf16.mxu1 %v1482_v18  ;;  %v797_v56 = vld [vmem:[#allocation7 + $0x118] sm:$0xff]  ;;  %v782_v57 = vld [vmem:[#allocation7 + $0xa0] sm:$0xff]  ;;  %v783_v58 = vld [vmem:[#allocation7 + $0xa8] sm:$0xff]  ;;  %v1496_v62 = vpack.c.bf16 %v765_v53, %v764_v52 }
  0x86   : > { %v275_v59 = vld [vmem:[%s2011_s14 + $0x8] sm:$0xff]  ;;  %v814_v60 = vld [vmem:[#allocation7 + $0x1a0] sm:$0xff]  ;;  %v1528_v63 = vpack.c.bf16 %v797_v56, %v796_v54  ;;  %v1498_v1 = vpack.c.bf16 %v783_v58, %v782_v57  ;;  %v784_v7 = vld [vmem:[#allocation7 + $0xb0] sm:$0xff] }
  0x87   : > { %1453 = vmatpush1.bf16.msra.mxu0 %v1452_v24  ;;  %v815_v61 = vld [vmem:[#allocation7 + $0x1a8] sm:$0xff]  ;;  %v766_v2 = vld [vmem:[#allocation7 + $0x20] sm:$0xff]  ;;  %v785_v8 = vld [vmem:[#allocation7 + $0xb8] sm:$0xff] }
  0x88   : > { %1485 = vmatpush1.bf16.msra.mxu1 %v1484_v25  ;;  %1455 = vmatprep.subr.bf16.mxu0 %v1454_v26  ;;  %v767_v3 = vld [vmem:[#allocation7 + $0x28] sm:$0xff]  ;;  %v798_v4 = vld [vmem:[#allocation7 + $0x120] sm:$0xff]  ;;  %v1530_v5 = vpack.c.bf16 %v815_v61, %v814_v60  ;;  %v276_v9 = vld [vmem:[%s2011_s14 + $0x10] sm:$0xff]  ;;  %v1502_v14 = vpack.c.bf16 %v785_v8, %v784_v7 }
  0x89   : > { %1487 = vmatprep.subr.bf16.mxu1 %v1486_v29  ;;  %v799_v6 = vld [vmem:[#allocation7 + $0x128] sm:$0xff]  ;;  %v816_v10 = vld [vmem:[#allocation7 + $0x1b0] sm:$0xff]  ;;  %v817_v11 = vld [vmem:[#allocation7 + $0x1b8] sm:$0xff]  ;;  %v1500_v12 = vpack.c.bf16 %v767_v3, %v766_v2 }
  0x8a   : > { %v1532_v13 = vpack.c.bf16 %v799_v6, %v798_v4  ;;  %v768_v15 = vld [vmem:[#allocation7 + $0x30] sm:$0xff]  ;;  %v769_v16 = vld [vmem:[#allocation7 + $0x38] sm:$0xff]  ;;  %v1534_v18 = vpack.c.bf16 %v817_v11, %v816_v10  ;;  %v786_v20 = vld [vmem:[#allocation7 + $0xc0] sm:$0xff] }
  0x8b   : > { %1457 = vmatpush1.bf16.msra.mxu0 %v1456_v34  ;;  %v800_v17 = vld [vmem:[#allocation7 + $0x130] sm:$0xff]  ;;  %v801_v19 = vld [vmem:[#allocation7 + $0x138] sm:$0xff]  ;;  %v787_v21 = vld [vmem:[#allocation7 + $0xc8] sm:$0xff]  ;;  %v1504_v25 = vpack.c.bf16 %v769_v16, %v768_v15 }
  0x8c   : > { %1489 = vmatpush1.bf16.msra.mxu1 %v1488_v37  ;;  %1491 = vmatprep.subr.bf16.mxu0 %v1490_v38  ;;  %v277_v22 = vld [vmem:[%s2011_s14 + $0x18] sm:$0xff]  ;;  %v818_v23 = vld [vmem:[#allocation7 + $0x1c0] sm:$0xff]  ;;  %v819_v24 = vld [vmem:[#allocation7 + $0x1c8] sm:$0xff]  ;;  %v1536_v26 = vpack.c.bf16 %v801_v19, %v800_v17  ;;  %v1506_v27 = vpack.c.bf16 %v787_v21, %v786_v20  ;;  %v356_v20 = vlaneseq }
  0x8d   : > { %1523 = vmatprep.subr.bf16.mxu1 %v1522_v41  ;;  %v770_v28 = vld [vmem:[#allocation7 + $0x40] sm:$0xff]  ;;  %v771_v29 = vld [vmem:[#allocation7 + $0x48] sm:$0xff]  ;;  %v1538_v31 = vpack.c.bf16 %v819_v24, %v818_v23  ;;  %v788_v33 = vld [vmem:[#allocation7 + $0xd0] sm:$0xff] }
  0x8e   : > { %441 = vmatmul.mubr.f32.vlgmr.msra.gmra.mrb[0].mxu0 %v274_v46  ;;  %v802_v30 = vld [vmem:[#allocation7 + $0x140] sm:$0xff]  ;;  %v803_v32 = vld [vmem:[#allocation7 + $0x148] sm:$0xff]  ;;  %v789_v34 = vld [vmem:[#allocation7 + $0xd8] sm:$0xff]  ;;  %v1508_v38 = vpack.c.bf16 %v771_v29, %v770_v28  ;;  %v357_v21 = vshrl.u32 %v356_v20, 7 }
  0x8f   : > { %602 = vmatmul.mubr.f32.vlgmr.msra.gmra.mrb[0].mxu1 %v274_v46  ;;  %446 = vmatprep.mubr.f32.mxu0 %v1793_v0  ;;  %v278_v35 = vld [vmem:[%s2011_s14 + $0x20] sm:$0xff]  ;;  %v820_v36 = vld [vmem:[#allocation7 + $0x1d0] sm:$0xff]  ;;  %v821_v37 = vld [vmem:[#allocation7 + $0x1d8] sm:$0xff]  ;;  %v1540_v39 = vpack.c.bf16 %v803_v32, %v802_v30  ;;  %v1510_v40 = vpack.c.bf16 %v789_v34, %v788_v33 }
  0x90   : > { %607 = vmatprep.mubr.f32.mxu1 %v1793_v0  ;;  %1493 = vmatpush3.bf16.msra.mxu0 %v1492_v49  ;;  %v772_v41 = vld [vmem:[#allocation7 + $0x50] sm:$0xff]  ;;  %v773_v42 = vld [vmem:[#allocation7 + $0x58] sm:$0xff]  ;;  %v1542_v44 = vpack.c.bf16 %v821_v37, %v820_v36  ;;  %v790_v46 = vld [vmem:[#allocation7 + $0xe0] sm:$0xff]  ;;  %v366_v24 = vsub.s32 2, %v357_v21 }
  0x91   : > { %1525 = vmatpush3.bf16.msra.mxu1 %v1524_v50  ;;  %1495 = vmatprep.subr.bf16.mxu0 %v1494_v51  ;;  %v804_v43 = vld [vmem:[#allocation7 + $0x150] sm:$0xff]  ;;  %v805_v45 = vld [vmem:[#allocation7 + $0x158] sm:$0xff]  ;;  %v791_v47 = vld [vmem:[#allocation7 + $0xe8] sm:$0xff]  ;;  %v1512_v51 = vpack.c.bf16 %v773_v42, %v772_v41 }
  0x92   : > { %447 = vmatmul.mubr.f32.gmra.mrb[2].mxu0 %v275_v59  ;;  %1527 = vmatprep.subr.bf16.mxu1 %v1526_v55  ;;  %v279_v48 = vld [vmem:[%s2011_s14 + $0x28] sm:$0xff]  ;;  %v822_v49 = vld [vmem:[#allocation7 + $0x1e0] sm:$0xff]  ;;  %v1544_v52 = vpack.c.bf16 %v805_v45, %v804_v43  ;;  %v1514_v53 = vpack.c.bf16 %v791_v47, %v790_v46  ;;  %v793_v60 = vld [vmem:[#allocation7 + $0xf8] sm:$0xff] }
  0x93   : > { %608 = vmatmul.mubr.f32.gmra.mrb[2].mxu1 %v275_v59  ;;  %452 = vmatprep.mubr.f32.mxu0 %v1793_v0  ;;  %v823_v50 = vld [vmem:[#allocation7 + $0x1e8] sm:$0xff]  ;;  %v774_v54 = vld [vmem:[#allocation7 + $0x60] sm:$0xff]  ;;  %v792_v59 = vld [vmem:[#allocation7 + $0xf0] sm:$0xff] }
  0x94   : > { %613 = vmatprep.mubr.f32.mxu1 %v1793_v0  ;;  %1497 = vmatpush3.bf16.msra.mxu0 %v1496_v62  ;;  %v775_v55 = vld [vmem:[#allocation7 + $0x68] sm:$0xff]  ;;  %v806_v56 = vld [vmem:[#allocation7 + $0x160] sm:$0xff]  ;;  %v1546_v57 = vpack.c.bf16 %v823_v50, %v822_v49  ;;  %v280_v61 = vld [vmem:[%s2011_s14 + $0x30] sm:$0xff] }
  0x95   : > { %1529 = vmatpush3.bf16.msra.mxu1 %v1528_v63  ;;  %1499 = vmatprep.subr.bf16.mxu0 %v1498_v1  ;;  %v807_v58 = vld [vmem:[#allocation7 + $0x168] sm:$0xff]  ;;  %v1516_v62 = vpack.c.bf16 %v775_v55, %v774_v54  ;;  %v1518_v1 = vpack.c.bf16 %v793_v60, %v792_v59  ;;  %v776_v2 = vld [vmem:[#allocation7 + $0x70] sm:$0xff]  ;;  %v777_v3 = vld [vmem:[#allocation7 + $0x78] sm:$0xff] }
  0x96   : > { %453 = vmatmul.mubr.f32.gmra.mrb[4].mxu0 %v276_v9  ;;  %1531 = vmatprep.subr.bf16.mxu1 %v1530_v5  ;;  %v1548_v63 = vpack.c.bf16 %v807_v58, %v806_v56  ;;  %v281_v4 = vld [vmem:[%s2011_s14 + $0x38] sm:$0xff]  ;;  %v1520_v5 = vpack.c.bf16 %v777_v3, %v776_v2  ;;  %v282_v6 = vld [vmem:[%s2011_s14 + $0x40] sm:$0xff]  ;;  %v283_v7 = vld [vmem:[%s2011_s14 + $0x48] sm:$0xff] }
  0x97   : > { %614 = vmatmul.mubr.f32.gmra.mrb[4].mxu1 %v276_v9  ;;  %458 = vmatprep.mubr.f32.mxu0 %v1793_v0  ;;  %v284_v8 = vld [vmem:[%s2011_s14 + $0x50] sm:$0xff]  ;;  %v285_v9 = vld [vmem:[%s2011_s14 + $0x58] sm:$0xff]  ;;  %v286_v10 = vld [vmem:[%s2011_s14 + $0x60] sm:$0xff] }
  0x98   : > { %619 = vmatprep.mubr.f32.mxu1 %v1793_v0  ;;  %1501 = vmatpush3.bf16.msra.mxu0 %v1500_v12  ;;  %v287_v11 = vld [vmem:[%s2011_s14 + $0x68] sm:$0xff]  ;;  %v288_v12 = vld [vmem:[%s2011_s14 + $0x70] sm:$0xff]  ;;  %v825_v15 = vld [vmem:[#allocation7 + $0x1f8] sm:$0xff] }
  0x99   : > { %1533 = vmatpush3.bf16.msra.mxu1 %v1532_v13  ;;  %1503 = vmatprep.subr.bf16.mxu0 %v1502_v14  ;;  %v289_v13 = vld [vmem:[%s2011_s14 + $0x78] sm:$0xff]  ;;  %v824_v14 = vld [vmem:[#allocation7 + $0x1f0] sm:$0xff]  ;;  %v354_v23 = vld [vmem:[%s2238_s2] sm:$0xf] }
  0x9a   : > { %459 = vmatmul.mubr.f32.gmra.mrb[6].mxu0 %v277_v22  ;;  %1535 = vmatprep.subr.bf16.mxu1 %v1534_v18  ;;  %v1550_v16 = vpack.c.bf16 %v825_v15, %v824_v14  ;;  %v808_v17 = vld [vmem:[#allocation7 + $0x170] sm:$0xff]  ;;  %v809_v18 = vld [vmem:[#allocation7 + $0x178] sm:$0xff] }
  0x9b   : > { %620 = vmatmul.mubr.f32.gmra.mrb[6].mxu1 %v277_v22  ;;  %464 = vmatprep.mubr.f32.mxu0 %v1793_v0  ;;  %v1552_v19 = vpack.c.bf16 %v809_v18, %v808_v17  ;;  %v358_v22 = vsub.s32 0, %v357_v21 }
  0x9c   : > { %625 = vmatprep.mubr.f32.mxu1 %v1793_v0  ;;  %1505 = vmatpush3.bf16.msra.mxu0 %v1504_v25  ;;  %v362_v25 = vsub.s32 1, %v357_v21 }
  0x9d   : > { %1537 = vmatpush3.bf16.msra.mxu1 %v1536_v26  ;;  %1507 = vmatprep.subr.bf16.mxu0 %v1506_v27  ;;  %v2072_v26 = vrot.slane %v354_v23, %v358_v22  ;;  %v2074_v27 = vrot.slane %v354_v23, %v366_v24 }
  0x9e   : > { %465 = vmatmul.mubr.f32.gmra.mrb[8].mxu0 %v278_v35  ;;  %1539 = vmatprep.subr.bf16.mxu1 %v1538_v31  ;;  %v2076_v28 = vrot.slane %v354_v23, %v362_v25 }
  0x9f   : > { %626 = vmatmul.mubr.f32.gmra.mrb[8].mxu1 %v278_v35  ;;  %470 = vmatprep.mubr.f32.mxu0 %v1793_v0 }
  0xa0   : > { %631 = vmatprep.mubr.f32.mxu1 %v1793_v0  ;;  %1509 = vmatpush3.bf16.msra.mxu0 %v1508_v38 }
  0xa1   : > { %1541 = vmatpush3.bf16.msra.mxu1 %v1540_v39  ;;  %1511 = vmatprep.subr.bf16.mxu0 %v1510_v40 }
  0xa2   : > { %471 = vmatmul.mubr.f32.gmra.mrb[10].mxu0 %v279_v48  ;;  %1543 = vmatprep.subr.bf16.mxu1 %v1542_v44 }
  0xa3   : > { %632 = vmatmul.mubr.f32.gmra.mrb[10].mxu1 %v279_v48  ;;  %476 = vmatprep.mubr.f32.mxu0 %v1793_v0 }
  0xa4   : > { %637 = vmatprep.mubr.f32.mxu1 %v1793_v0  ;;  %1513 = vmatpush3.bf16.msra.mxu0 %v1512_v51 }
  0xa5   : > { %1545 = vmatpush3.bf16.msra.mxu1 %v1544_v52  ;;  %1515 = vmatprep.subr.bf16.mxu0 %v1514_v53 }
  0xa6   : > { %477 = vmatmul.mubr.f32.gmra.mrb[12].mxu0 %v280_v61  ;;  %1547 = vmatprep.subr.bf16.mxu1 %v1546_v57 }
  0xa7   : > { %638 = vmatmul.mubr.f32.gmra.mrb[12].mxu1 %v280_v61  ;;  %482 = vmatprep.mubr.f32.mxu0 %v1793_v0 }
  0xa8   : > { %643 = vmatprep.mubr.f32.mxu1 %v1793_v0  ;;  %1517 = vmatpush3.bf16.msra.mxu0 %v1516_v62 }
  0xa9   : > { %1549 = vmatpush3.bf16.msra.mxu1 %v1548_v63  ;;  %1519 = vmatprep.subr.bf16.mxu0 %v1518_v1 }
  0xaa   : > { %483 = vmatmul.mubr.f32.gmra.mrb[14].mxu0 %v281_v4  ;;  %1551 = vmatprep.subr.bf16.mxu1 %v1550_v16 }
  0xab   : > { %644 = vmatmul.mubr.f32.gmra.mrb[14].mxu1 %v281_v4  ;;  %488 = vmatprep.mubr.f32.mxu0 %v1793_v0 }
  0xac   : > { %649 = vmatprep.mubr.f32.mxu1 %v1793_v0  ;;  %1521 = vmatpush3.bf16.msra.mxu0 %v1520_v5 }
  0xad   : > { %1553 = vmatpush3.bf16.msra.mxu1 %v1552_v19 }
  0xae   : > { %489 = vmatmul.mubr.f32.gmra.mrb[16].mxu0 %v282_v6 }
  0xaf   : > { %650 = vmatmul.mubr.f32.gmra.mrb[16].mxu1 %v282_v6  ;;  %494 = vmatprep.mubr.f32.mxu0 %v1793_v0 }
  0xb0   : > { %655 = vmatprep.mubr.f32.mxu1 %v1793_v0 }
  0xb2   : > { %495 = vmatmul.mubr.f32.gmra.mrb[18].mxu0 %v283_v7 }
  0xb3   : > { %656 = vmatmul.mubr.f32.gmra.mrb[18].mxu1 %v283_v7  ;;  %500 = vmatprep.mubr.f32.mxu0 %v1793_v0 }
  0xb4   : > { %661 = vmatprep.mubr.f32.mxu1 %v1793_v0 }
  0xb6   : > { %501 = vmatmul.mubr.f32.gmra.mrb[20].mxu0 %v284_v8 }
  0xb7   : > { %662 = vmatmul.mubr.f32.gmra.mrb[20].mxu1 %v284_v8  ;;  %506 = vmatprep.mubr.f32.mxu0 %v1793_v0 }
  0xb8   : > { %667 = vmatprep.mubr.f32.mxu1 %v1793_v0 }
  0xba   : > { %507 = vmatmul.mubr.f32.gmra.mrb[22].mxu0 %v285_v9 }
  0xbb   : > { %668 = vmatmul.mubr.f32.gmra.mrb[22].mxu1 %v285_v9  ;;  %512 = vmatprep.mubr.f32.mxu0 %v1793_v0 }
  0xbc   : > { %673 = vmatprep.mubr.f32.mxu1 %v1793_v0 }
  0xbe   : > { %513 = vmatmul.mubr.f32.gmra.mrb[24].mxu0 %v286_v10 }
  0xbf   : > { %674 = vmatmul.mubr.f32.gmra.mrb[24].mxu1 %v286_v10  ;;  %518 = vmatprep.mubr.f32.mxu0 %v1793_v0 }
  0xc0   : > { %679 = vmatprep.mubr.f32.mxu1 %v1793_v0 }
  0xc2   : > { %519 = vmatmul.mubr.f32.gmra.mrb[26].mxu0 %v287_v11 }
  0xc3   : > { %680 = vmatmul.mubr.f32.gmra.mrb[26].mxu1 %v287_v11  ;;  %524 = vmatprep.mubr.f32.mxu0 %v1793_v0 }
  0xc4   : > { %685 = vmatprep.mubr.f32.mxu1 %v1793_v0 }
  0xc6   : > { %525 = vmatmul.mubr.f32.gmra.mrb[28].mxu0 %v288_v12 }
  0xc7   : > { %686 = vmatmul.mubr.f32.gmra.mrb[28].mxu1 %v288_v12  ;;  %530 = vmatprep.mubr.f32.mxu0 %v1793_v0 }
  0xc8   : > { %691 = vmatprep.mubr.f32.mxu1 %v1793_v0  ;;  %v370_v0 = vsub.s32 3, %v357_v21 }
  0xca   : > { %531 = vmatmul.mubr.f32.gmra.mrb[30].mxu0 %v289_v13  ;;  %v2078_v29 = vrot.slane %v354_v23, %v370_v0 }
  0xcb   : > { %692 = vmatmul.mubr.f32.gmra.mrb[30].mxu1 %v289_v13 }
 0x161   : > { %v442_v30 = vpop.f32.mrb[0].mxu0 }
 0x162   : > { %v443_v31 = vadd.f32 %v442_v30, %v2072_v26  ;;  %v603_v32 = vpop.f32.mrb[0].mxu1  ;;  %v444_v33 = vpop.f32.mrb[1].mxu0 }
 0x163   : > { %v604_v34 = vadd.f32 %v603_v32, %v2074_v27  ;;  %v445_v35 = vadd.f32 %v444_v33, %v2076_v28  ;;  %v605_v36 = vpop.f32.mrb[1].mxu1 }
 0x164   : > { %v606_v37 = vadd.f32 %v605_v36, %v2078_v29  ;;  %v698_v41 = vmax.f32 %v443_v31, 0.0 }
 0x165   : > { %v700_v38 = vmax.f32 %v604_v34, 0.0  ;;  %v699_v39 = vmax.f32 %v445_v35, 0.0  ;;  %v448_v40 = vpop.f32.mrb[2].mxu0 }
 0x166   : > { %v701_v42 = vmax.f32 %v606_v37, 0.0  ;;  %v449_v43 = vadd.f32 %v448_v40, %v2072_v26  ;;  %v609_v44 = vpop.f32.mrb[2].mxu1  ;;  %v450_v45 = vpop.f32.mrb[3].mxu0 }
 0x167   : > { %v610_v46 = vadd.f32 %v609_v44, %v2074_v27  ;;  %v451_v47 = vadd.f32 %v450_v45, %v2076_v28  ;;  %v611_v48 = vpop.f32.mrb[3].mxu1  ;;  %897 = vmatprep.mubr.f32.mxu0 %v699_v39 }
 0x168   : > { %v612_v49 = vadd.f32 %v611_v48, %v2078_v29  ;;  %1042 = vmatprep.mubr.f32.mxu1 %v701_v42  ;;  %898 = vmatmul.mubr.f32.vlgmr.msra.gmra.mrb[32].mxu0 %v698_v41  ;;  %v702_v53 = vmax.f32 %v449_v43, 0.0 }
 0x169   : > { %v704_v50 = vmax.f32 %v610_v46, 0.0  ;;  %v703_v51 = vmax.f32 %v451_v47, 0.0  ;;  %1043 = vmatmul.mubr.f32.vlgmr.msra.gmra.mrb[32].mxu1 %v700_v38  ;;  %v454_v52 = vpop.f32.mrb[4].mxu0 }
 0x16a   : > { %v705_v54 = vmax.f32 %v612_v49, 0.0  ;;  %v455_v55 = vadd.f32 %v454_v52, %v2072_v26  ;;  %v615_v56 = vpop.f32.mrb[4].mxu1  ;;  %v456_v57 = vpop.f32.mrb[5].mxu0 }
 0x16b   : > { %v616_v58 = vadd.f32 %v615_v56, %v2074_v27  ;;  %v457_v59 = vadd.f32 %v456_v57, %v2076_v28  ;;  %v617_v60 = vpop.f32.mrb[5].mxu1  ;;  %902 = vmatprep.mubr.f32.mxu0 %v703_v51 }
 0x16c   : > { %v618_v61 = vadd.f32 %v617_v60, %v2078_v29  ;;  %1047 = vmatprep.mubr.f32.mxu1 %v705_v54  ;;  %903 = vmatmul.mubr.f32.gmra.mrb[34].mxu0 %v702_v53  ;;  %v706_v2 = vmax.f32 %v455_v55, 0.0 }
 0x16d   : > { %v708_v62 = vmax.f32 %v616_v58, 0.0  ;;  %v707_v63 = vmax.f32 %v457_v59, 0.0  ;;  %1048 = vmatmul.mubr.f32.gmra.mrb[34].mxu1 %v704_v50  ;;  %v460_v1 = vpop.f32.mrb[6].mxu0 }
 0x16e   : > { %v709_v3 = vmax.f32 %v618_v61, 0.0  ;;  %v461_v4 = vadd.f32 %v460_v1, %v2072_v26  ;;  %v621_v5 = vpop.f32.mrb[6].mxu1  ;;  %v462_v6 = vpop.f32.mrb[7].mxu0 }
 0x16f   : > { %v622_v7 = vadd.f32 %v621_v5, %v2074_v27  ;;  %v463_v8 = vadd.f32 %v462_v6, %v2076_v28  ;;  %v623_v9 = vpop.f32.mrb[7].mxu1  ;;  %907 = vmatprep.mubr.f32.mxu0 %v707_v63 }
 0x170   : > { %v624_v10 = vadd.f32 %v623_v9, %v2078_v29  ;;  %1052 = vmatprep.mubr.f32.mxu1 %v709_v3  ;;  %908 = vmatmul.mubr.f32.gmra.mrb[36].mxu0 %v706_v2  ;;  %v710_v14 = vmax.f32 %v461_v4, 0.0 }
 0x171   : > { %v712_v11 = vmax.f32 %v622_v7, 0.0  ;;  %v711_v12 = vmax.f32 %v463_v8, 0.0  ;;  %1053 = vmatmul.mubr.f32.gmra.mrb[36].mxu1 %v708_v62  ;;  %v466_v13 = vpop.f32.mrb[8].mxu0 }
 0x172   : > { %v713_v15 = vmax.f32 %v624_v10, 0.0  ;;  %v467_v16 = vadd.f32 %v466_v13, %v2072_v26  ;;  %v627_v17 = vpop.f32.mrb[8].mxu1  ;;  %v468_v18 = vpop.f32.mrb[9].mxu0 }
 0x173   : > { %v628_v19 = vadd.f32 %v627_v17, %v2074_v27  ;;  %v469_v20 = vadd.f32 %v468_v18, %v2076_v28  ;;  %v629_v21 = vpop.f32.mrb[9].mxu1  ;;  %912 = vmatprep.mubr.f32.mxu0 %v711_v12 }
 0x174   : > { %v630_v22 = vadd.f32 %v629_v21, %v2078_v29  ;;  %1057 = vmatprep.mubr.f32.mxu1 %v713_v15  ;;  %913 = vmatmul.mubr.f32.gmra.mrb[38].mxu0 %v710_v14  ;;  %v714_v0 = vmax.f32 %v467_v16, 0.0 }
 0x175   : > { %v716_v23 = vmax.f32 %v628_v19, 0.0  ;;  %v715_v24 = vmax.f32 %v469_v20, 0.0  ;;  %1058 = vmatmul.mubr.f32.gmra.mrb[38].mxu1 %v712_v11  ;;  %v472_v25 = vpop.f32.mrb[10].mxu0 }
 0x176   : > { %v717_v30 = vmax.f32 %v630_v22, 0.0  ;;  %v473_v31 = vadd.f32 %v472_v25, %v2072_v26  ;;  %v633_v32 = vpop.f32.mrb[10].mxu1  ;;  %v474_v33 = vpop.f32.mrb[11].mxu0 }
 0x177   : > { %v634_v34 = vadd.f32 %v633_v32, %v2074_v27  ;;  %v475_v35 = vadd.f32 %v474_v33, %v2076_v28  ;;  %v635_v36 = vpop.f32.mrb[11].mxu1  ;;  %917 = vmatprep.mubr.f32.mxu0 %v715_v24 }
 0x178   : > { %v636_v37 = vadd.f32 %v635_v36, %v2078_v29  ;;  %1062 = vmatprep.mubr.f32.mxu1 %v717_v30  ;;  %918 = vmatmul.mubr.f32.gmra.mrb[40].mxu0 %v714_v0  ;;  %v718_v41 = vmax.f32 %v473_v31, 0.0 }
 0x179   : > { %v720_v38 = vmax.f32 %v634_v34, 0.0  ;;  %v719_v39 = vmax.f32 %v475_v35, 0.0  ;;  %1063 = vmatmul.mubr.f32.gmra.mrb[40].mxu1 %v716_v23  ;;  %v478_v40 = vpop.f32.mrb[12].mxu0 }
 0x17a   : > { %v721_v42 = vmax.f32 %v636_v37, 0.0  ;;  %v479_v43 = vadd.f32 %v478_v40, %v2072_v26  ;;  %v639_v44 = vpop.f32.mrb[12].mxu1  ;;  %v480_v45 = vpop.f32.mrb[13].mxu0 }
 0x17b   : > { %v640_v46 = vadd.f32 %v639_v44, %v2074_v27  ;;  %v481_v47 = vadd.f32 %v480_v45, %v2076_v28  ;;  %v641_v48 = vpop.f32.mrb[13].mxu1  ;;  %922 = vmatprep.mubr.f32.mxu0 %v719_v39 }
 0x17c   : > { %v642_v49 = vadd.f32 %v641_v48, %v2078_v29  ;;  %1067 = vmatprep.mubr.f32.mxu1 %v721_v42  ;;  %923 = vmatmul.mubr.f32.gmra.mrb[42].mxu0 %v718_v41  ;;  %v722_v53 = vmax.f32 %v479_v43, 0.0 }
 0x17d   : > { %v724_v50 = vmax.f32 %v640_v46, 0.0  ;;  %v723_v51 = vmax.f32 %v481_v47, 0.0  ;;  %1068 = vmatmul.mubr.f32.gmra.mrb[42].mxu1 %v720_v38  ;;  %v484_v52 = vpop.f32.mrb[14].mxu0 }
 0x17e   : > { %v725_v54 = vmax.f32 %v642_v49, 0.0  ;;  %v485_v55 = vadd.f32 %v484_v52, %v2072_v26  ;;  %v645_v56 = vpop.f32.mrb[14].mxu1  ;;  %v486_v57 = vpop.f32.mrb[15].mxu0 }
 0x17f   : > { %v646_v58 = vadd.f32 %v645_v56, %v2074_v27  ;;  %v487_v59 = vadd.f32 %v486_v57, %v2076_v28  ;;  %v647_v60 = vpop.f32.mrb[15].mxu1  ;;  %927 = vmatprep.mubr.f32.mxu0 %v723_v51 }
 0x180   : > { %v648_v61 = vadd.f32 %v647_v60, %v2078_v29  ;;  %1072 = vmatprep.mubr.f32.mxu1 %v725_v54  ;;  %928 = vmatmul.mubr.f32.gmra.mrb[44].mxu0 %v722_v53  ;;  %v726_v2 = vmax.f32 %v485_v55, 0.0 }
 0x181   : > { %v728_v62 = vmax.f32 %v646_v58, 0.0  ;;  %v727_v63 = vmax.f32 %v487_v59, 0.0  ;;  %1073 = vmatmul.mubr.f32.gmra.mrb[44].mxu1 %v724_v50  ;;  %v490_v1 = vpop.f32.mrb[16].mxu0 }
 0x182   : > { %v729_v3 = vmax.f32 %v648_v61, 0.0  ;;  %v491_v4 = vadd.f32 %v490_v1, %v2072_v26  ;;  %v651_v5 = vpop.f32.mrb[16].mxu1  ;;  %v492_v6 = vpop.f32.mrb[17].mxu0 }
 0x183   : > { %v652_v7 = vadd.f32 %v651_v5, %v2074_v27  ;;  %v493_v8 = vadd.f32 %v492_v6, %v2076_v28  ;;  %v653_v9 = vpop.f32.mrb[17].mxu1  ;;  %932 = vmatprep.mubr.f32.mxu0 %v727_v63 }
 0x184   : > { %v654_v10 = vadd.f32 %v653_v9, %v2078_v29  ;;  %1077 = vmatprep.mubr.f32.mxu1 %v729_v3  ;;  %933 = vmatmul.mubr.f32.gmra.mrb[46].mxu0 %v726_v2  ;;  %v730_v14 = vmax.f32 %v491_v4, 0.0 }
 0x185   : > { %v732_v11 = vmax.f32 %v652_v7, 0.0  ;;  %v731_v12 = vmax.f32 %v493_v8, 0.0  ;;  %1078 = vmatmul.mubr.f32.gmra.mrb[46].mxu1 %v728_v62  ;;  %v496_v13 = vpop.f32.mrb[18].mxu0 }
 0x186   : > { %v733_v15 = vmax.f32 %v654_v10, 0.0  ;;  %v497_v16 = vadd.f32 %v496_v13, %v2072_v26  ;;  %v657_v17 = vpop.f32.mrb[18].mxu1  ;;  %v498_v18 = vpop.f32.mrb[19].mxu0 }
 0x187   : > { %v658_v19 = vadd.f32 %v657_v17, %v2074_v27  ;;  %v499_v20 = vadd.f32 %v498_v18, %v2076_v28  ;;  %v659_v21 = vpop.f32.mrb[19].mxu1  ;;  %937 = vmatprep.mubr.f32.mxu0 %v731_v12 }
 0x188   : > { %v660_v22 = vadd.f32 %v659_v21, %v2078_v29  ;;  %1082 = vmatprep.mubr.f32.mxu1 %v733_v15  ;;  %938 = vmatmul.mubr.f32.gmra.mrb[48].mxu0 %v730_v14  ;;  %v734_v0 = vmax.f32 %v497_v16, 0.0 }
 0x189   : > { %v736_v23 = vmax.f32 %v658_v19, 0.0  ;;  %v735_v24 = vmax.f32 %v499_v20, 0.0  ;;  %1083 = vmatmul.mubr.f32.gmra.mrb[48].mxu1 %v732_v11  ;;  %v502_v25 = vpop.f32.mrb[20].mxu0 }
 0x18a   : > { %v737_v30 = vmax.f32 %v660_v22, 0.0  ;;  %v503_v31 = vadd.f32 %v502_v25, %v2072_v26  ;;  %v663_v32 = vpop.f32.mrb[20].mxu1  ;;  %v504_v33 = vpop.f32.mrb[21].mxu0 }
 0x18b   : > { %v664_v34 = vadd.f32 %v663_v32, %v2074_v27  ;;  %v505_v35 = vadd.f32 %v504_v33, %v2076_v28  ;;  %v665_v36 = vpop.f32.mrb[21].mxu1  ;;  %942 = vmatprep.mubr.f32.mxu0 %v735_v24 }
 0x18c   : > { %v666_v37 = vadd.f32 %v665_v36, %v2078_v29  ;;  %1087 = vmatprep.mubr.f32.mxu1 %v737_v30  ;;  %943 = vmatmul.mubr.f32.gmra.mrb[50].mxu0 %v734_v0  ;;  %v738_v41 = vmax.f32 %v503_v31, 0.0 }
 0x18d   : > { %v740_v38 = vmax.f32 %v664_v34, 0.0  ;;  %v739_v39 = vmax.f32 %v505_v35, 0.0  ;;  %1088 = vmatmul.mubr.f32.gmra.mrb[50].mxu1 %v736_v23  ;;  %v508_v40 = vpop.f32.mrb[22].mxu0 }
 0x18e   : > { %v741_v42 = vmax.f32 %v666_v37, 0.0  ;;  %v509_v43 = vadd.f32 %v508_v40, %v2072_v26  ;;  %v669_v44 = vpop.f32.mrb[22].mxu1  ;;  %v510_v45 = vpop.f32.mrb[23].mxu0 }
 0x18f   : > { %v670_v46 = vadd.f32 %v669_v44, %v2074_v27  ;;  %v511_v47 = vadd.f32 %v510_v45, %v2076_v28  ;;  %v671_v48 = vpop.f32.mrb[23].mxu1  ;;  %947 = vmatprep.mubr.f32.mxu0 %v739_v39 }
 0x190   : > { %v672_v49 = vadd.f32 %v671_v48, %v2078_v29  ;;  %1092 = vmatprep.mubr.f32.mxu1 %v741_v42  ;;  %948 = vmatmul.mubr.f32.gmra.mrb[52].mxu0 %v738_v41  ;;  %v742_v53 = vmax.f32 %v509_v43, 0.0 }
 0x191   : > { %v744_v50 = vmax.f32 %v670_v46, 0.0  ;;  %v743_v51 = vmax.f32 %v511_v47, 0.0  ;;  %1093 = vmatmul.mubr.f32.gmra.mrb[52].mxu1 %v740_v38  ;;  %v514_v52 = vpop.f32.mrb[24].mxu0 }
 0x192   : > { %v745_v54 = vmax.f32 %v672_v49, 0.0  ;;  %v515_v55 = vadd.f32 %v514_v52, %v2072_v26  ;;  %v675_v56 = vpop.f32.mrb[24].mxu1  ;;  %v516_v57 = vpop.f32.mrb[25].mxu0 }
 0x193   : > { %v676_v58 = vadd.f32 %v675_v56, %v2074_v27  ;;  %v517_v59 = vadd.f32 %v516_v57, %v2076_v28  ;;  %v677_v60 = vpop.f32.mrb[25].mxu1  ;;  %952 = vmatprep.mubr.f32.mxu0 %v743_v51 }
 0x194   : > { %v678_v61 = vadd.f32 %v677_v60, %v2078_v29  ;;  %1097 = vmatprep.mubr.f32.mxu1 %v745_v54  ;;  %953 = vmatmul.mubr.f32.gmra.mrb[54].mxu0 %v742_v53  ;;  %v746_v2 = vmax.f32 %v515_v55, 0.0 }
 0x195   : > { %v748_v62 = vmax.f32 %v676_v58, 0.0  ;;  %v747_v63 = vmax.f32 %v517_v59, 0.0  ;;  %1098 = vmatmul.mubr.f32.gmra.mrb[54].mxu1 %v744_v50  ;;  %v520_v1 = vpop.f32.mrb[26].mxu0 }
 0x196   : > { %v749_v3 = vmax.f32 %v678_v61, 0.0  ;;  %v521_v4 = vadd.f32 %v520_v1, %v2072_v26  ;;  %v681_v5 = vpop.f32.mrb[26].mxu1  ;;  %v522_v6 = vpop.f32.mrb[27].mxu0 }
 0x197   : > { %v682_v7 = vadd.f32 %v681_v5, %v2074_v27  ;;  %v523_v8 = vadd.f32 %v522_v6, %v2076_v28  ;;  %v683_v9 = vpop.f32.mrb[27].mxu1  ;;  %957 = vmatprep.mubr.f32.mxu0 %v747_v63 }
 0x198   : > { %v684_v10 = vadd.f32 %v683_v9, %v2078_v29  ;;  %1102 = vmatprep.mubr.f32.mxu1 %v749_v3  ;;  %958 = vmatmul.mubr.f32.gmra.mrb[56].mxu0 %v746_v2  ;;  %v750_v14 = vmax.f32 %v521_v4, 0.0 }
 0x199   : > { %v752_v11 = vmax.f32 %v682_v7, 0.0  ;;  %v751_v12 = vmax.f32 %v523_v8, 0.0  ;;  %1103 = vmatmul.mubr.f32.gmra.mrb[56].mxu1 %v748_v62  ;;  %v526_v13 = vpop.f32.mrb[28].mxu0 }
 0x19a   : > { %v753_v15 = vmax.f32 %v684_v10, 0.0  ;;  %v527_v16 = vadd.f32 %v526_v13, %v2072_v26  ;;  %v687_v17 = vpop.f32.mrb[28].mxu1  ;;  %v528_v18 = vpop.f32.mrb[29].mxu0 }
 0x19b   : > { %v688_v19 = vadd.f32 %v687_v17, %v2074_v27  ;;  %v529_v20 = vadd.f32 %v528_v18, %v2076_v28  ;;  %v689_v21 = vpop.f32.mrb[29].mxu1  ;;  %962 = vmatprep.mubr.f32.mxu0 %v751_v12 }
 0x19c   : > { %v690_v22 = vadd.f32 %v689_v21, %v2078_v29  ;;  %1107 = vmatprep.mubr.f32.mxu1 %v753_v15  ;;  %963 = vmatmul.mubr.f32.gmra.mrb[58].mxu0 %v750_v14  ;;  %v754_v0 = vmax.f32 %v527_v16, 0.0 }
 0x19d   : > { %v756_v23 = vmax.f32 %v688_v19, 0.0  ;;  %v755_v24 = vmax.f32 %v529_v20, 0.0  ;;  %1108 = vmatmul.mubr.f32.gmra.mrb[58].mxu1 %v752_v11  ;;  %v532_v25 = vpop.f32.mrb[30].mxu0 }
 0x19e   : > { %v757_v30 = vmax.f32 %v690_v22, 0.0  ;;  %v533_v31 = vadd.f32 %v532_v25, %v2072_v26  ;;  %v693_v32 = vpop.f32.mrb[30].mxu1  ;;  %v534_v33 = vpop.f32.mrb[31].mxu0 }
 0x19f   : > { %v694_v34 = vadd.f32 %v693_v32, %v2074_v27  ;;  %v535_v35 = vadd.f32 %v534_v33, %v2076_v28  ;;  %v695_v36 = vpop.f32.mrb[31].mxu1  ;;  %967 = vmatprep.mubr.f32.mxu0 %v755_v24  ;;  %v2147_v28 = vld [vmem:[%s2240_s4] ss:$0 sm:$0xff] }
 0x1a0   : > { %v696_v37 = vadd.f32 %v695_v36, %v2078_v29  ;;  %1112 = vmatprep.mubr.f32.mxu1 %v757_v30  ;;  %968 = vmatmul.mubr.f32.gmra.mrb[60].mxu0 %v754_v0  ;;  %v758_v40 = vmax.f32 %v533_v31, 0.0 }
 0x1a1   : > { %v760_v38 = vmax.f32 %v694_v34, 0.0  ;;  %v759_v39 = vmax.f32 %v535_v35, 0.0  ;;  %1113 = vmatmul.mubr.f32.gmra.mrb[60].mxu1 %v756_v23 }
 0x1a2   : > { %v761_v41 = vmax.f32 %v696_v37, 0.0 }
 0x1a3   : > { %972 = vmatprep.mubr.f32.mxu0 %v759_v39 }
 0x1a4   : > { %1117 = vmatprep.mubr.f32.mxu1 %v761_v41  ;;  %973 = vmatmul.mubr.f32.gmra.mrb[62].mxu0 %v758_v40 }
 0x1a5   : > { %1118 = vmatmul.mubr.f32.gmra.mrb[62].mxu1 %v760_v38 }
 0x23b   : > { %v1298_v26 = vpop.f32.mrb[32].mxu0 }
 0x23c   : > { %v1378_v27 = vpop.f32.mrb[32].mxu1  ;;  %v1299_v29 = vpop.f32.mrb[33].mxu0 }
 0x23d   : > { %v1300_v42 = vadd.f32 %v1299_v29, %v1298_v26  ;;  %v1379_v43 = vpop.f32.mrb[33].mxu1 }
 0x23e   : > { %v1380_v44 = vadd.f32 %v1379_v43, %v1378_v27 }
 0x23f   : > { %v900_v45 = vadd.f32 %v1300_v42, %v2147_v28  ;;  %v1301_v46 = vpop.f32.mrb[34].mxu0 }
 0x240   : > { %v1381_v47 = vpop.f32.mrb[34].mxu1  ;;  %v1302_v48 = vpop.f32.mrb[35].mxu0 }
 0x241   : > { %v1045_v49 = vadd.f32 %v1380_v44, %v900_v45  ;;  %v1303_v50 = vadd.f32 %v1302_v48, %v1301_v46  ;;  %v1382_v51 = vpop.f32.mrb[35].mxu1 }
 0x242   : > { %v1383_v52 = vadd.f32 %v1382_v51, %v1381_v47 }
 0x243   : > { %1123 = vst [vmem:[%s2152_s10] sm:$0xff] %v1045_v49  ;;  %v905_v53 = vadd.f32 %v1303_v50, %v2147_v28  ;;  %v1304_v54 = vpop.f32.mrb[36].mxu0 }
 0x244   : > { %v1384_v55 = vpop.f32.mrb[36].mxu1  ;;  %v1305_v56 = vpop.f32.mrb[37].mxu0 }
 0x245   : > { %v1050_v57 = vadd.f32 %v1383_v52, %v905_v53  ;;  %v1306_v58 = vadd.f32 %v1305_v56, %v1304_v54  ;;  %v1385_v59 = vpop.f32.mrb[37].mxu1 }
 0x246   : > { %v1386_v60 = vadd.f32 %v1385_v59, %v1384_v55 }
 0x247   : > { %1124 = vst [vmem:[%s2152_s10 + $0x8] sm:$0xff] %v1050_v57  ;;  %v910_v61 = vadd.f32 %v1306_v58, %v2147_v28  ;;  %v1307_v62 = vpop.f32.mrb[38].mxu0 }
 0x248   : > { %v1387_v63 = vpop.f32.mrb[38].mxu1  ;;  %v1308_v1 = vpop.f32.mrb[39].mxu0 }
 0x249   : > { %v1055_v2 = vadd.f32 %v1386_v60, %v910_v61  ;;  %v1309_v3 = vadd.f32 %v1308_v1, %v1307_v62  ;;  %v1388_v4 = vpop.f32.mrb[39].mxu1 }
 0x24a   : > { %v1389_v5 = vadd.f32 %v1388_v4, %v1387_v63 }
 0x24b   : > { %1125 = vst [vmem:[%s2152_s10 + $0x10] sm:$0xff] %v1055_v2  ;;  %v915_v6 = vadd.f32 %v1309_v3, %v2147_v28  ;;  %v1310_v7 = vpop.f32.mrb[40].mxu0 }
 0x24c   : > { %v1390_v8 = vpop.f32.mrb[40].mxu1  ;;  %v1311_v9 = vpop.f32.mrb[41].mxu0 }
 0x24d   : > { %v1060_v10 = vadd.f32 %v1389_v5, %v915_v6  ;;  %v1312_v11 = vadd.f32 %v1311_v9, %v1310_v7  ;;  %v1391_v12 = vpop.f32.mrb[41].mxu1 }
 0x24e   : > { %v1392_v13 = vadd.f32 %v1391_v12, %v1390_v8 }
 0x24f   : > { %1126 = vst [vmem:[%s2152_s10 + $0x18] sm:$0xff] %v1060_v10  ;;  %v920_v14 = vadd.f32 %v1312_v11, %v2147_v28  ;;  %v1313_v15 = vpop.f32.mrb[42].mxu0 }
 0x250   : > { %v1393_v16 = vpop.f32.mrb[42].mxu1  ;;  %v1314_v17 = vpop.f32.mrb[43].mxu0 }
 0x251   : > { %v1065_v18 = vadd.f32 %v1392_v13, %v920_v14  ;;  %v1315_v19 = vadd.f32 %v1314_v17, %v1313_v15  ;;  %v1394_v20 = vpop.f32.mrb[43].mxu1 }
 0x252   : > { %v1395_v21 = vadd.f32 %v1394_v20, %v1393_v16 }
 0x253   : > { %1127 = vst [vmem:[%s2152_s10 + $0x20] sm:$0xff] %v1065_v18  ;;  %v925_v22 = vadd.f32 %v1315_v19, %v2147_v28  ;;  %v1316_v23 = vpop.f32.mrb[44].mxu0 }
 0x254   : > { %v1396_v24 = vpop.f32.mrb[44].mxu1  ;;  %v1317_v25 = vpop.f32.mrb[45].mxu0 }
 0x255   : > { %v1070_v0 = vadd.f32 %v1395_v21, %v925_v22  ;;  %v1318_v30 = vadd.f32 %v1317_v25, %v1316_v23  ;;  %v1397_v31 = vpop.f32.mrb[45].mxu1 }
 0x256   : > { %v1398_v32 = vadd.f32 %v1397_v31, %v1396_v24 }
 0x257   : > { %1128 = vst [vmem:[%s2152_s10 + $0x28] sm:$0xff] %v1070_v0  ;;  %v930_v33 = vadd.f32 %v1318_v30, %v2147_v28  ;;  %v1319_v34 = vpop.f32.mrb[46].mxu0 }
 0x258   : > { %v1399_v35 = vpop.f32.mrb[46].mxu1  ;;  %v1320_v36 = vpop.f32.mrb[47].mxu0 }
 0x259   : > { %v1075_v37 = vadd.f32 %v1398_v32, %v930_v33  ;;  %v1321_v38 = vadd.f32 %v1320_v36, %v1319_v34  ;;  %v1400_v39 = vpop.f32.mrb[47].mxu1 }
 0x25a   : > { %v1401_v40 = vadd.f32 %v1400_v39, %v1399_v35 }
 0x25b   : > { %1129 = vst [vmem:[%s2152_s10 + $0x30] sm:$0xff] %v1075_v37  ;;  %v935_v41 = vadd.f32 %v1321_v38, %v2147_v28  ;;  %v1322_v26 = vpop.f32.mrb[48].mxu0 }
 0x25c   : > { %v1402_v27 = vpop.f32.mrb[48].mxu1  ;;  %v1323_v29 = vpop.f32.mrb[49].mxu0 }
 0x25d   : > { %v1080_v42 = vadd.f32 %v1401_v40, %v935_v41  ;;  %v1324_v43 = vadd.f32 %v1323_v29, %v1322_v26  ;;  %v1403_v44 = vpop.f32.mrb[49].mxu1 }
 0x25e   : > { %v1404_v45 = vadd.f32 %v1403_v44, %v1402_v27 }
 0x25f   : > { %1130 = vst [vmem:[%s2152_s10 + $0x38] sm:$0xff] %v1080_v42  ;;  %v940_v46 = vadd.f32 %v1324_v43, %v2147_v28  ;;  %v1325_v47 = vpop.f32.mrb[50].mxu0 }
 0x260   : > { %v1405_v48 = vpop.f32.mrb[50].mxu1  ;;  %v1326_v49 = vpop.f32.mrb[51].mxu0 }
 0x261   : > { %v1085_v50 = vadd.f32 %v1404_v45, %v940_v46  ;;  %v1327_v51 = vadd.f32 %v1326_v49, %v1325_v47  ;;  %v1406_v52 = vpop.f32.mrb[51].mxu1 }
 0x262   : > { %v1407_v53 = vadd.f32 %v1406_v52, %v1405_v48 }
 0x263   : > { %1131 = vst [vmem:[%s2152_s10 + $0x40] sm:$0xff] %v1085_v50  ;;  %v945_v54 = vadd.f32 %v1327_v51, %v2147_v28  ;;  %v1328_v55 = vpop.f32.mrb[52].mxu0 }
 0x264   : > { %v1408_v56 = vpop.f32.mrb[52].mxu1  ;;  %v1329_v57 = vpop.f32.mrb[53].mxu0 }
 0x265   : > { %v1090_v58 = vadd.f32 %v1407_v53, %v945_v54  ;;  %v1330_v59 = vadd.f32 %v1329_v57, %v1328_v55  ;;  %v1409_v60 = vpop.f32.mrb[53].mxu1 }
 0x266   : > { %v1410_v61 = vadd.f32 %v1409_v60, %v1408_v56 }
 0x267   : > { %1132 = vst [vmem:[%s2152_s10 + $0x48] sm:$0xff] %v1090_v58  ;;  %v950_v62 = vadd.f32 %v1330_v59, %v2147_v28  ;;  %v1331_v63 = vpop.f32.mrb[54].mxu0 }
 0x268   : > { %v1411_v1 = vpop.f32.mrb[54].mxu1  ;;  %v1332_v2 = vpop.f32.mrb[55].mxu0 }
 0x269   : > { %v1095_v3 = vadd.f32 %v1410_v61, %v950_v62  ;;  %v1333_v4 = vadd.f32 %v1332_v2, %v1331_v63  ;;  %v1412_v5 = vpop.f32.mrb[55].mxu1 }
 0x26a   : > { %v1413_v6 = vadd.f32 %v1412_v5, %v1411_v1 }
 0x26b   : > { %1133 = vst [vmem:[%s2152_s10 + $0x50] sm:$0xff] %v1095_v3  ;;  %v955_v7 = vadd.f32 %v1333_v4, %v2147_v28  ;;  %v1334_v8 = vpop.f32.mrb[56].mxu0 }
 0x26c   : > { %v1414_v9 = vpop.f32.mrb[56].mxu1  ;;  %v1335_v10 = vpop.f32.mrb[57].mxu0 }
 0x26d   : > { %v1100_v11 = vadd.f32 %v1413_v6, %v955_v7  ;;  %v1336_v12 = vadd.f32 %v1335_v10, %v1334_v8  ;;  %v1415_v13 = vpop.f32.mrb[57].mxu1 }
 0x26e   : > { %v1416_v14 = vadd.f32 %v1415_v13, %v1414_v9 }
 0x26f   : > { %1134 = vst [vmem:[%s2152_s10 + $0x58] sm:$0xff] %v1100_v11  ;;  %v960_v15 = vadd.f32 %v1336_v12, %v2147_v28  ;;  %v1337_v16 = vpop.f32.mrb[58].mxu0 }
 0x270   : > { %v1417_v17 = vpop.f32.mrb[58].mxu1  ;;  %v1338_v18 = vpop.f32.mrb[59].mxu0 }
 0x271   : > { %v1105_v19 = vadd.f32 %v1416_v14, %v960_v15  ;;  %v1339_v20 = vadd.f32 %v1338_v18, %v1337_v16  ;;  %v1418_v21 = vpop.f32.mrb[59].mxu1 }
 0x272   : > { %v1419_v22 = vadd.f32 %v1418_v21, %v1417_v17 }
 0x273   : > { %1135 = vst [vmem:[%s2152_s10 + $0x60] sm:$0xff] %v1105_v19  ;;  %v965_v23 = vadd.f32 %v1339_v20, %v2147_v28  ;;  %v1340_v24 = vpop.f32.mrb[60].mxu0 }
 0x274   : > { %v1420_v25 = vpop.f32.mrb[60].mxu1  ;;  %v1341_v0 = vpop.f32.mrb[61].mxu0 }
 0x275   : > { %v1110_v30 = vadd.f32 %v1419_v22, %v965_v23  ;;  %v1342_v31 = vadd.f32 %v1341_v0, %v1340_v24  ;;  %v1421_v32 = vpop.f32.mrb[61].mxu1 }
 0x276   : > { %v1422_v33 = vadd.f32 %v1421_v32, %v1420_v25 }
 0x277   : > { %1136 = vst [vmem:[%s2152_s10 + $0x68] sm:$0xff] %v1110_v30  ;;  %v970_v34 = vadd.f32 %v1342_v31, %v2147_v28  ;;  %v1343_v35 = vpop.f32.mrb[62].mxu0 }
 0x278   : > { %v1423_v36 = vpop.f32.mrb[62].mxu1  ;;  %v1344_v37 = vpop.f32.mrb[63].mxu0 }
 0x279   : > { %v1115_v38 = vadd.f32 %v1422_v33, %v970_v34  ;;  %v1345_v39 = vadd.f32 %v1344_v37, %v1343_v35  ;;  %v1424_v40 = vpop.f32.mrb[63].mxu1 }
 0x27a   : > { %v1425_v41 = vadd.f32 %v1424_v40, %v1423_v36 }
 0x27b   : > { %1137 = vst [vmem:[%s2152_s10 + $0x70] sm:$0xff] %v1115_v38  ;;  %v975_v26 = vadd.f32 %v1345_v39, %v2147_v28 }
 0x27d   : > { %v1120_v27 = vadd.f32 %v1425_v41, %v975_v26 }
 0x27f   : > { %1138 = vst [vmem:[%s2152_s10 + $0x78] sm:$0xff] %v1120_v27 }
 0x280   : > { %1727 = shalt.err (!%p1724_p2)
}
 0x281   : > { %s1728_s14 = scalar_lea.hbm %s2189_s11, 2048  ;;  %s1732_s12 = scalar_lea.hbm %s2241_s5, 4096 }
 0x282   : > { %p1729_p13 = scmp.ne.s32.totalorder %s2189_s11, %s1728_s14  ;;  %p1733_p4 = scmp.lt.u32.totalorder %s2189_s11, %s2241_s5 }
 0x283   : > { %p1734_p7 = scmp.lt.u32.totalorder %s1732_s12, %s1728_s14  ;;  %p1736_p11 = scmp.lt.u32.totalorder %s1728_s14, %s2189_s11 }
 0x284   : > { %p1730_p6 = pnand %p1729_p13, %p2255_p0 }
 0x285   : > { %p1735_p8 = por %p1734_p7, %p1733_p4 }
 0x286   : > { %p1731_p10 = pneg %p1730_p6 }
 0x287   : > { %p1737_p1 = por %p1736_p11, %p1735_p8 }
 0x289   : > { %p1738_p3 = pnand %p1737_p1, %p1731_p10 }
 0x28b   : > { %1741 = shalt.err (!%p1738_p3)
}
 0x28c   : > { %s1795_s28 = smov 128   ;;  %s1796_s9 = smov 8  }
 0x28d   : > { %1564 = dma.vmem_to_hbm [thread:$0]  (%p2255_p0), %s2191_s15, 2048, %s2189_s11, %s1140_s23, %s1795_s28, %s1795_s28, %s1796_s9  }
 0x28e PF: > { %s1168_s30 = sand.u32 1, %s1772_s18   ;;  %p2256_p5 = scmp.ne.s32.totalorder %s2246_s25, 0 }
 0x28f   : > { %p2257_p9 = scmp.ge.s32.totalorder %s1784_s21, 2  ;;  %s1169_s7 = scalar_lea.sflag [#allocation4], %s1168_s30 }
 0x291   : > { %p1578_p12 = pnand %p2257_p9, %p2256_p5 }
 0x293   : > { %1767 = dma.done.wait (!%p1578_p12), %s1169_s7, 2048  }
 0x294   : > { %1769 = vsyncadd (!%p1578_p12), %s1169_s7, 4294965248  ;;  %p19_p2 = scmp.ge.s32.totalorder %s1940_s16, 4   ;;  %s2258_s18 = smov %s1776_s19 }
 0x295   : > { %s2259_s19 = smov %s1780_s20  ;;  %s2260_s20 = smov %s1949_s27 }
 0x296   : > { %s2261_s21 = smov %s1940_s16  ;;  %21 = sbr.rel (!%p19_p2) target bundleno = 6 (0x6), region = 93 }
 0x29d   :  { %1174 = vsyncpa [#allocation3], 1 }
 0x29e   :  { %1176 = vsyncpa [#allocation3 + $0x1], 1 }
 0x29f   :  { %1177 = vsyncpa [#allocation6], 1 }
 0x2a0   :  { %1178 = vsyncpa [#allocation4], 1 }
 0x2a1   :  { %1180 = vsyncpa [#allocation4 + $0x1], 1 }

</bundles_post_ra>
